<compile_context>
chip_gen: v7x
topology: tpu7x:2x2x1
jax: 0.10.0
libtpu: 0.0.40
codegen_flags: <defaults>
</compile_context>

<pallas_src>
import functools

import numpy as np
import jax
import jax.numpy as jnp
from jax.experimental import pallas as pl
from jax.experimental.pallas import tpu as pltpu


COMPUTE_DTYPE = jnp.bfloat16


def _round_up(x, m):
    return (x + m - 1) // m * m


@functools.lru_cache(maxsize=None)
def _vmem_limit_bytes():
    """Per-generation VMEM budget: ~half of physical, capped at 64 MiB."""
    try:
        cap = pltpu.get_tpu_info().vmem_capacity_bytes
    except Exception:
        cap = 64 * 1024 * 1024          # conservative (v7x-sized) fallback
    return int(min(cap // 2, 64 * 1024 * 1024))


def _pick_row_block(oh, ow):
    """Largest divisor of OH keeping <= ~2048 output rows (M) per grid step."""
    cap = max(1, 2048 // max(ow, 1))
    best = 1
    for d in range(1, oh + 1):
        if oh % d == 0 and d <= cap:
            best = d
    return best


# ------------------------------ Pallas kernels ----------------------------- #
def _conv_tap_kernel(x_ref, w_ref, o_ref, *, taps_h, taps_w, ow, tr, slope):
    """Fused conv (effective stride 1) + LeakyReLU, per-tap MXU accumulation.

    x_ref: (1, Hp, Wp, Cin_eff)  full (padded / s2d) image, VMEM resident
    w_ref: (taps_h, taps_w, Cin_eff, TN)  resident weight tile
    o_ref: (1, tr, ow, TN)  block of output rows for this grid step
    """
    base = pl.program_id(2) * tr
    tn = w_ref.shape[-1]

    def row_body(t, carry):
        acc = jnp.zeros((ow, tn), jnp.float32)
        for i in range(taps_h):                       # static tap loops
            for j in range(taps_w):
                a = x_ref[0, base + t + i, pl.ds(j, ow), :]     # (ow, Cin_eff)
                acc = acc + jnp.dot(a, w_ref[i, j],
                                    preferred_element_type=jnp.float32)
        y = jnp.where(acc >= 0, acc, slope * acc)
        o_ref[0, t] = y.astype(o_ref.dtype)
        return carry

    jax.lax.fori_loop(0, tr, row_body, 0)


def _final_mean_kernel(a_ref, w_ref, o_ref, acc_ref, *, inv_n):
    """Final 4x4 conv (OC=1) fused with the batch mean; tiled over batch."""
    @pl.when(pl.program_id(0) == 0)
    def _():
        acc_ref[...] = jnp.zeros_like(acc_ref)

    a = a_ref[...].astype(jnp.float32)                   # (TB, K)
    w = w_ref[...].astype(jnp.float32)                   # (1, K), broadcasts
    per_sample = jnp.sum(a * w, axis=1, keepdims=True)   # (TB, 1)
    acc_ref[...] += jnp.sum(per_sample, axis=0, keepdims=True)

    @pl.when(pl.program_id(0) == pl.num_programs(0) - 1)
    def _():
        o_ref[...] = acc_ref[...] * inv_n


# ------------------------------ layer wrappers ----------------------------- #
def _prep_conv_input(x, pad, stride):
    """Spatial zero-pad + (for stride 2) 2x2 space-to-depth; fused XLA glue."""
    if pad:
        x = jnp.pad(x, ((0, 0), (pad, pad), (pad, pad), (0, 0)))
    if stride == 2:
        n, hp, wp, c = x.shape
        assert hp % 2 == 0 and wp % 2 == 0
        x = x.reshape(n, hp // 2, 2, wp // 2, 2, c)
        x = x.transpose(0, 1, 3, 2, 4, 5).reshape(n, hp // 2, wp // 2, 4 * c)
    else:
        assert stride == 1
    return x


def conv2d_leaky_fused(x, layer, slope=0.2):
    """Conv2d(bias=False) + LeakyReLU; NHWC (channel-padded) in / out."""
    n = x.shape[0]
    z = _prep_conv_input(x, layer['pad'], layer['stride'])
    _, hp, wp, ce = z.shape
    assert ce == layer['cin_eff'], (ce, layer['cin_eff'])
    kh, kw = layer['ekh'], layer['ekw']
    oh, ow = hp - kh + 1, wp - kw + 1
    ocp, tn = layer['ocp'], layer['tn']
    tr = _pick_row_block(oh, ow)

    kernel = functools.partial(_conv_tap_kernel, taps_h=kh, taps_w=kw,
                               ow=ow, tr=tr, slope=slope)
    return pl.pallas_call(
        kernel,
        out_shape=jax.ShapeDtypeStruct((n, oh, ow, ocp), x.dtype),
        grid_spec=pltpu.PrefetchScalarGridSpec(
            num_scalar_prefetch=0,
            grid=(ocp // tn, n, oh // tr),
            in_specs=[
                # one full image per batch index; re-DMA'd only when b changes
                pl.BlockSpec((1, hp, wp, ce), lambda j, b, r: (b, 0, 0, 0)),
                # weight tile: block index constant across b and r -> resident
                pl.BlockSpec((kh, kw, ce, tn), lambda j, b, r: (0, 0, 0, j)),
            ],
            out_specs=pl.BlockSpec((1, tr, ow, tn),
                                   lambda j, b, r: (b, r, 0, j)),
        ),
        compiler_params=pltpu.CompilerParams(
            dimension_semantics=("parallel", "parallel", "parallel"),
            vmem_limit_bytes=_vmem_limit_bytes()),
    )(z, layer['wk'])


def conv2d_final_mean(x, layer):
    """Final Conv2d(cndf -> 1, 4, 1, 0) fused with mean over batch."""
    n, h, w, cp = x.shape
    k = layer['k']
    assert h == k and w == k
    kdim = k * k * cp
    a = x.reshape(n, kdim)                               # (N, K); (kh, kw, c)
    tb = 8
    n_pad = _round_up(n, tb)
    if n_pad != n:
        a = jnp.pad(a, ((0, n_pad - n), (0, 0)))         # zero rows: no effect

    out = pl.pallas_call(
        functools.partial(_final_mean_kernel, inv_n=1.0 / n),
        out_shape=jax.ShapeDtypeStruct((1, 1), jnp.float32),
        grid_spec=pltpu.PrefetchScalarGridSpec(
            num_scalar_prefetch=0,
            grid=(n_pad // tb,),
            in_specs=[pl.BlockSpec((tb, kdim), lambda i: (i, 0)),
                      pl.BlockSpec((1, kdim), lambda i: (0, 0))],
            out_specs=pl.BlockSpec((1, 1), lambda i: (0, 0)),
            scratch_shapes=[pltpu.VMEM((1, 1), jnp.float32)]),
        compiler_params=pltpu.CompilerParams(
            dimension_semantics=("arbitrary",)),
    )(a, layer['wrow'])
    return out.reshape(1)


# ------------------------- model definition / params ----------------------- #
def init_dcgan_d_params(key, isize, nc, ndf, n_extra_layers=0):
    """Raw PyTorch-layout (OC, IC, KH, KW) f32 weights, matching the module."""
    assert isize % 16 == 0, 'isize has to be a multiple of 16'

    def mk_w(k, oc, ic, ks):
        return (0.02 * jax.random.normal(k, (oc, ic, ks, ks))).astype(jnp.float32)

    keys = iter(jax.random.split(key, 64))
    raw = []
    # initial block: Conv2d(nc, ndf, 4, 2, 1) + LeakyReLU(0.2)
    raw.append(('conv_leaky', mk_w(next(keys), ndf, nc, 4), 2, 1))
    csize, cndf = isize // 2, ndf
    # extra layers: Conv2d(cndf, cndf, 3, 1, 1) + LeakyReLU(0.2)
    for _ in range(n_extra_layers):
        raw.append(('conv_leaky', mk_w(next(keys), cndf, cndf, 3), 1, 1))
    # pyramid: Conv2d(cndf, 2*cndf, 4, 2, 1) + LeakyReLU(0.2)
    while csize > 4:
        raw.append(('conv_leaky', mk_w(next(keys), cndf * 2, cndf, 4), 2, 1))
        cndf *= 2
        csize //= 2
    # final: Conv2d(cndf, 1, 4, 1, 0)
    raw.append(('final', mk_w(next(keys), 1, cndf, 4), 1, 0))
    return raw


def prepare_layers(raw_params, compute_dtype=COMPUTE_DTYPE):
    """Pack weights once: tap-major (KH',KW',Cin_pad,OC_pad) bf16 matrices.

    Input-channel rows covering the previous layer's channel padding are zero,
    so padded activations flow between layers without any slice/re-pad glue.
    Stride-2 4x4 weights are re-packed as stride-1 2x2 over 4*Cin (s2d) channels.
    """
    layers = []
    cin_p = raw_params[0][1].shape[1]       # first layer: unpadded nc channels
    for kind, w, stride, pad in raw_params:
        oc, cin, k, k2 = w.shape
        assert k == k2 and cin <= cin_p
        whw = jnp.transpose(w, (2, 3, 1, 0))                       # (k, k, cin, oc)
        whw = jnp.pad(whw, ((0, 0), (0, 0), (0, cin_p - cin), (0, 0)))
        if kind == 'conv_leaky':
            ocp = _round_up(oc, 128)
            whw = jnp.pad(whw, ((0, 0), (0, 0), (0, 0), (0, ocp - oc)))
            if stride == 2:
                assert k == 4 and pad == 1
                wk = whw.reshape(2, 2, 2, 2, cin_p, ocp)           # (qh,rh,qw,rw,c,o)
                wk = jnp.transpose(wk, (0, 2, 1, 3, 4, 5))         # (qh,qw,rh,rw,c,o)
                wk = wk.reshape(2, 2, 4 * cin_p, ocp)
                ekh = ekw = 2
                cin_eff = 4 * cin_p
            else:
                assert stride == 1
                wk = whw
                ekh = ekw = k
                cin_eff = cin_p
            if ocp <= 512:
                tn = ocp
            elif ocp % 512 == 0:
                tn = 512
            elif ocp % 256 == 0:
                tn = 256
            else:
                tn = 128
            layers.append(dict(kind=kind, wk=wk.astype(compute_dtype),
                               stride=stride, pad=pad, ekh=ekh, ekw=ekw,
                               cin_eff=cin_eff, ocp=ocp, tn=tn))
            cin_p = ocp
        else:
            assert stride == 1 and pad == 0 and oc == 1
            wrow = whw.reshape(k * k * cin_p, 1).T.astype(compute_dtype)  # (1, K)
            layers.append(dict(kind=kind, wrow=wrow, k=k))
    return layers


def dcgan_d_forward(x_nchw, layers, compute_dtype=COMPUTE_DTYPE):
    # single layout change at the boundary: NCHW -> NHWC (channels on lanes)
    x = jnp.transpose(x_nchw, (0, 2, 3, 1)).astype(compute_dtype)
    for layer in layers:
        if layer['kind'] == 'conv_leaky':
            x = conv2d_leaky_fused(x, layer, slope=0.2)
        else:
            x = conv2d_final_mean(x, layer)
    return x  # shape (1,), float32


# ------------------------------ pure-JAX reference ------------------------- #
def dcgan_d_reference(x_nchw, raw_params, compute_dtype=COMPUTE_DTYPE):
    """Same math, same bf16 operand precision, via lax.conv (for validation)."""
    x = x_nchw.astype(compute_dtype)
    for kind, w, stride, pad in raw_params:
        y = jax.lax.conv_general_dilated(
            x.astype(compute_dtype), w.astype(compute_dtype),
            window_strides=(stride, stride),
            padding=[(pad, pad), (pad, pad)],
            dimension_numbers=('NCHW', 'OIHW', 'NCHW'),
            preferred_element_type=jnp.float32)
        if kind == 'conv_leaky':
            x = jnp.where(y >= 0, y, 0.2 * y).astype(compute_dtype)
        else:
            x = jnp.mean(y, axis=0).reshape(1)
    return x


if __name__ == "__main__":
    key = jax.random.PRNGKey(0)
    kx, kp = jax.random.split(key)

    # Small config consistent with the module: isize=16, nc=4, ndf=8, batch=2,
    # n_extra_layers=1.  Layers: 4->8 (16->8), 8->8 extra (8->8),
    # 8->16 pyramid (8->4), 16->1 final (4->1), then mean over batch.
    isize, nc, ndf, batch, n_extra = 16, 4, 8, 2, 1
    x = jax.random.normal(kx, (batch, nc, isize, isize), dtype=jnp.float32)

    raw_params = init_dcgan_d_params(kp, isize, nc, ndf, n_extra_layers=n_extra)
    layers = prepare_layers(raw_params)

    fwd = jax.jit(lambda xx: dcgan_d_forward(xx, layers))
    out = jax.block_until_ready(fwd(x))
    ref = jax.block_until_ready(dcgan_d_reference(x, raw_params))

    assert out.shape == (1,), out.shape
    if not np.allclose(np.asarray(out, dtype=np.float32),
                       np.asarray(ref, dtype=np.float32),
                       rtol=2e-2, atol=1e-4):
        raise AssertionError(f"mismatch vs reference: {out} vs {ref}")
    print("KERNEL_OK")
</pallas_src>

<mosaic_0001>
module attributes {stable_mosaic.version = 11 : i64} {
  func.func @_conv_tap_kernel(%arg0: i32, %arg1: i32, %arg2: i32, %arg3: memref<1x9x9x16xbf16, #tpu.memory_space<vmem>>, %arg4: memref<2x2x16x128xbf16, #tpu.memory_space<vmem>>, %arg5: memref<1x8x8x128xbf16, #tpu.memory_space<vmem>>) attributes {dimension_semantics = [#tpu.dimension_semantics<parallel>, #tpu.dimension_semantics<parallel>, #tpu.dimension_semantics<parallel>], iteration_bounds = array<i64: 1, 2, 1>, scalar_prefetch = 0 : i64, scratch_operands = 0 : i64, tpu.core_type = #tpu.core_type<tc>, window_params = [{transform_indices = @transform_0, window_bounds = array<i64: 1, 9, 9, 16>}, {transform_indices = @transform_1, window_bounds = array<i64: 2, 2, 16, 128>}, {transform_indices = @transform_2, window_bounds = array<i64: 1, 8, 8, 128>}]} {
    %c8_i32 = arith.constant 8 : i32
    %0 = arith.muli %arg2, %c8_i32 : i32
    %c0_i32 = arith.constant 0 : i32
    %c8_i32_0 = arith.constant 8 : i32
    %1 = arith.addi %c0_i32, %c8_i32_0 : i32
    %c1_i32 = arith.constant 1 : i32
    scf.for %arg6 = %c0_i32 to %1 step %c1_i32  : i32 {
      %cst = arith.constant 0.000000e+00 : f32
      %2 = vector.broadcast %cst : f32 to vector<8x128xf32>
      %3 = arith.addi %0, %arg6 : i32
      %c0_i32_2 = arith.constant 0 : i32
      %4 = arith.addi %3, %c0_i32_2 : i32
      %c0 = arith.constant 0 : index
      %5 = arith.index_cast %4 : i32 to index
      %c0_3 = arith.constant 0 : index
      %c0_4 = arith.constant 0 : index
      %6 = vector.load %arg3[%c0, %5, %c0_3, %c0_4] : memref<1x9x9x16xbf16, #tpu.memory_space<vmem>>, vector<1x1x8x16xbf16>
      %7 = vector.shape_cast %6 : vector<1x1x8x16xbf16> to vector<8x16xbf16>
      %c0_5 = arith.constant 0 : index
      %c0_6 = arith.constant 0 : index
      %c0_7 = arith.constant 0 : index
      %c0_8 = arith.constant 0 : index
      %8 = vector.load %arg4[%c0_5, %c0_6, %c0_7, %c0_8] : memref<2x2x16x128xbf16, #tpu.memory_space<vmem>>, vector<1x1x16x128xbf16>
      %9 = vector.shape_cast %8 : vector<1x1x16x128xbf16> to vector<16x128xbf16>
      %cst_9 = arith.constant dense<0.000000e+00> : vector<8x128xf32>
      %10 = tpu.matmul %7, %9, %cst_9 {dimension_numbers = #tpu.dot_dimension_numbers<[1], [0], [0], [1], [0, 0, 1, 1], [], []>} : vector<8x16xbf16>, vector<16x128xbf16>, vector<8x128xf32> -> vector<8x128xf32>
      %11 = arith.addf %2, %10 : vector<8x128xf32>
      %12 = arith.addi %0, %arg6 : i32
      %c0_i32_10 = arith.constant 0 : i32
      %13 = arith.addi %12, %c0_i32_10 : i32
      %c0_11 = arith.constant 0 : index
      %14 = arith.index_cast %13 : i32 to index
      %c1 = arith.constant 1 : index
      %c0_12 = arith.constant 0 : index
      %15 = vector.load %arg3[%c0_11, %14, %c1, %c0_12] : memref<1x9x9x16xbf16, #tpu.memory_space<vmem>>, vector<1x1x8x16xbf16>
      %16 = vector.shape_cast %15 : vector<1x1x8x16xbf16> to vector<8x16xbf16>
      %c0_13 = arith.constant 0 : index
      %c1_14 = arith.constant 1 : index
      %c0_15 = arith.constant 0 : index
      %c0_16 = arith.constant 0 : index
      %17 = vector.load %arg4[%c0_13, %c1_14, %c0_15, %c0_16] : memref<2x2x16x128xbf16, #tpu.memory_space<vmem>>, vector<1x1x16x128xbf16>
      %18 = vector.shape_cast %17 : vector<1x1x16x128xbf16> to vector<16x128xbf16>
      %cst_17 = arith.constant dense<0.000000e+00> : vector<8x128xf32>
      %19 = tpu.matmul %16, %18, %cst_17 {dimension_numbers = #tpu.dot_dimension_numbers<[1], [0], [0], [1], [0, 0, 1, 1], [], []>} : vector<8x16xbf16>, vector<16x128xbf16>, vector<8x128xf32> -> vector<8x128xf32>
      %20 = arith.addf %11, %19 : vector<8x128xf32>
      %21 = arith.addi %0, %arg6 : i32
      %c1_i32_18 = arith.constant 1 : i32
      %22 = arith.addi %21, %c1_i32_18 : i32
      %c0_19 = arith.constant 0 : index
      %23 = arith.index_cast %22 : i32 to index
      %c0_20 = arith.constant 0 : index
      %c0_21 = arith.constant 0 : index
      %24 = vector.load %arg3[%c0_19, %23, %c0_20, %c0_21] : memref<1x9x9x16xbf16, #tpu.memory_space<vmem>>, vector<1x1x8x16xbf16>
      %25 = vector.shape_cast %24 : vector<1x1x8x16xbf16> to vector<8x16xbf16>
      %c1_22 = arith.constant 1 : index
      %c0_23 = arith.constant 0 : index
      %c0_24 = arith.constant 0 : index
      %c0_25 = arith.constant 0 : index
      %26 = vector.load %arg4[%c1_22, %c0_23, %c0_24, %c0_25] : memref<2x2x16x128xbf16, #tpu.memory_space<vmem>>, vector<1x1x16x128xbf16>
      %27 = vector.shape_cast %26 : vector<1x1x16x128xbf16> to vector<16x128xbf16>
      %cst_26 = arith.constant dense<0.000000e+00> : vector<8x128xf32>
      %28 = tpu.matmul %25, %27, %cst_26 {dimension_numbers = #tpu.dot_dimension_numbers<[1], [0], [0], [1], [0, 0, 1, 1], [], []>} : vector<8x16xbf16>, vector<16x128xbf16>, vector<8x128xf32> -> vector<8x128xf32>
      %29 = arith.addf %20, %28 : vector<8x128xf32>
      %30 = arith.addi %0, %arg6 : i32
      %c1_i32_27 = arith.constant 1 : i32
      %31 = arith.addi %30, %c1_i32_27 : i32
      %c0_28 = arith.constant 0 : index
      %32 = arith.index_cast %31 : i32 to index
      %c1_29 = arith.constant 1 : index
      %c0_30 = arith.constant 0 : index
      %33 = vector.load %arg3[%c0_28, %32, %c1_29, %c0_30] : memref<1x9x9x16xbf16, #tpu.memory_space<vmem>>, vector<1x1x8x16xbf16>
      %34 = vector.shape_cast %33 : vector<1x1x8x16xbf16> to vector<8x16xbf16>
      %c1_31 = arith.constant 1 : index
      %c1_32 = arith.constant 1 : index
      %c0_33 = arith.constant 0 : index
      %c0_34 = arith.constant 0 : index
      %35 = vector.load %arg4[%c1_31, %c1_32, %c0_33, %c0_34] : memref<2x2x16x128xbf16, #tpu.memory_space<vmem>>, vector<1x1x16x128xbf16>
      %36 = vector.shape_cast %35 : vector<1x1x16x128xbf16> to vector<16x128xbf16>
      %cst_35 = arith.constant dense<0.000000e+00> : vector<8x128xf32>
      %37 = tpu.matmul %34, %36, %cst_35 {dimension_numbers = #tpu.dot_dimension_numbers<[1], [0], [0], [1], [0, 0, 1, 1], [], []>} : vector<8x16xbf16>, vector<16x128xbf16>, vector<8x128xf32> -> vector<8x128xf32>
      %38 = arith.addf %29, %37 : vector<8x128xf32>
      %cst_36 = arith.constant 0.000000e+00 : f32
      %39 = vector.broadcast %cst_36 : f32 to vector<8x128xf32>
      %40 = arith.cmpf oge, %38, %39 : vector<8x128xf32>
      %cst_37 = arith.constant 2.000000e-01 : f32
      %41 = vector.broadcast %cst_37 : f32 to vector<8x128xf32>
      %42 = arith.mulf %41, %38 : vector<8x128xf32>
      %43 = arith.select %40, %38, %42 : vector<8x128xi1>, vector<8x128xf32>
      %44 = arith.truncf %43 : vector<8x128xf32> to vector<8x128xbf16>
      %c0_38 = arith.constant 0 : index
      %45 = arith.index_cast %arg6 : i32 to index
      %c0_39 = arith.constant 0 : index
      %c0_40 = arith.constant 0 : index
      %46 = vector.load %arg5[%c0_38, %45, %c0_39, %c0_40] : memref<1x8x8x128xbf16, #tpu.memory_space<vmem>>, vector<1x1x8x128xbf16>
      %47 = vector.shape_cast %46 : vector<1x1x8x128xbf16> to vector<8x128xbf16>
      %48 = vector.shape_cast %44 : vector<8x128xbf16> to vector<1x1x8x128xbf16>
      tpu.vector_store %arg5[%c0_38, %45, %c0_39, %c0_40], %48 {strides = array<i32>} : memref<1x8x8x128xbf16, #tpu.memory_space<vmem>>, vector<1x1x8x128xbf16>,
    }
    %c8_i32_1 = arith.constant 8 : i32
    return
  }
  func.func @transform_0(%arg0: i32, %arg1: i32, %arg2: i32) -> (i32, i32, i32, i32) {
    %c0_i32 = arith.constant 0 : i32
    %c0_i32_0 = arith.constant 0 : i32
    %c0_i32_1 = arith.constant 0 : i32
    %c0_i32_2 = arith.constant 0 : i32
    return %arg1, %c0_i32, %c0_i32_0, %c0_i32_1 : i32, i32, i32, i32
  }
  func.func @transform_1(%arg0: i32, %arg1: i32, %arg2: i32) -> (i32, i32, i32, i32) {
    %c0_i32 = arith.constant 0 : i32
    %c0_i32_0 = arith.constant 0 : i32
    %c0_i32_1 = arith.constant 0 : i32
    %c0_i32_2 = arith.constant 0 : i32
    return %c0_i32, %c0_i32_0, %c0_i32_1, %arg0 : i32, i32, i32, i32
  }
  func.func @transform_2(%arg0: i32, %arg1: i32, %arg2: i32) -> (i32, i32, i32, i32) {
    %c0_i32 = arith.constant 0 : i32
    %c0_i32_0 = arith.constant 0 : i32
    return %arg1, %arg2, %c0_i32, %arg0 : i32, i32, i32, i32
  }
}

module attributes {stable_mosaic.version = 11 : i64} {
  func.func @_conv_tap_kernel(%arg0: i32, %arg1: i32, %arg2: i32, %arg3: memref<1x10x10x128xbf16, #tpu.memory_space<vmem>>, %arg4: memref<3x3x128x128xbf16, #tpu.memory_space<vmem>>, %arg5: memref<1x8x8x128xbf16, #tpu.memory_space<vmem>>) attributes {dimension_semantics = [#tpu.dimension_semantics<parallel>, #tpu.dimension_semantics<parallel>, #tpu.dimension_semantics<parallel>], iteration_bounds = array<i64: 1, 2, 1>, scalar_prefetch = 0 : i64, scratch_operands = 0 : i64, tpu.core_type = #tpu.core_type<tc>, window_params = [{transform_indices = @transform_0, window_bounds = array<i64: 1, 10, 10, 128>}, {transform_indices = @transform_1, window_bounds = array<i64: 3, 3, 128, 128>}, {transform_indices = @transform_2, window_bounds = array<i64: 1, 8, 8, 128>}]} {
    %c8_i32 = arith.constant 8 : i32
    %0 = arith.muli %arg2, %c8_i32 : i32
    %c0_i32 = arith.constant 0 : i32
    %c8_i32_0 = arith.constant 8 : i32
    %1 = arith.addi %c0_i32, %c8_i32_0 : i32
    %c1_i32 = arith.constant 1 : i32
    scf.for %arg6 = %c0_i32 to %1 step %c1_i32  : i32 {
      %cst = arith.constant 0.000000e+00 : f32
      %2 = vector.broadcast %cst : f32 to vector<8x128xf32>
      %3 = arith.addi %0, %arg6 : i32
      %c0_i32_2 = arith.constant 0 : i32
      %4 = arith.addi %3, %c0_i32_2 : i32
      %c0 = arith.constant 0 : index
      %5 = arith.index_cast %4 : i32 to index
      %c0_3 = arith.constant 0 : index
      %c0_4 = arith.constant 0 : index
      %6 = vector.load %arg3[%c0, %5, %c0_3, %c0_4] : memref<1x10x10x128xbf16, #tpu.memory_space<vmem>>, vector<1x1x8x128xbf16>
      %7 = vector.shape_cast %6 : vector<1x1x8x128xbf16> to vector<8x128xbf16>
      %c0_5 = arith.constant 0 : index
      %c0_6 = arith.constant 0 : index
      %c0_7 = arith.constant 0 : index
      %c0_8 = arith.constant 0 : index
      %8 = vector.load %arg4[%c0_5, %c0_6, %c0_7, %c0_8] : memref<3x3x128x128xbf16, #tpu.memory_space<vmem>>, vector<1x1x128x128xbf16>
      %9 = vector.shape_cast %8 : vector<1x1x128x128xbf16> to vector<128x128xbf16>
      %cst_9 = arith.constant dense<0.000000e+00> : vector<8x128xf32>
      %10 = tpu.matmul %7, %9, %cst_9 {dimension_numbers = #tpu.dot_dimension_numbers<[1], [0], [0], [1], [0, 0, 1, 1], [], []>} : vector<8x128xbf16>, vector<128x128xbf16>, vector<8x128xf32> -> vector<8x128xf32>
      %11 = arith.addf %2, %10 : vector<8x128xf32>
      %12 = arith.addi %0, %arg6 : i32
      %c0_i32_10 = arith.constant 0 : i32
      %13 = arith.addi %12, %c0_i32_10 : i32
      %c0_11 = arith.constant 0 : index
      %14 = arith.index_cast %13 : i32 to index
      %c1 = arith.constant 1 : index
      %c0_12 = arith.constant 0 : index
      %15 = vector.load %arg3[%c0_11, %14, %c1, %c0_12] : memref<1x10x10x128xbf16, #tpu.memory_space<vmem>>, vector<1x1x8x128xbf16>
      %16 = vector.shape_cast %15 : vector<1x1x8x128xbf16> to vector<8x128xbf16>
      %c0_13 = arith.constant 0 : index
      %c1_14 = arith.constant 1 : index
      %c0_15 = arith.constant 0 : index
      %c0_16 = arith.constant 0 : index
      %17 = vector.load %arg4[%c0_13, %c1_14, %c0_15, %c0_16] : memref<3x3x128x128xbf16, #tpu.memory_space<vmem>>, vector<1x1x128x128xbf16>
      %18 = vector.shape_cast %17 : vector<1x1x128x128xbf16> to vector<128x128xbf16>
      %cst_17 = arith.constant dense<0.000000e+00> : vector<8x128xf32>
      %19 = tpu.matmul %16, %18, %cst_17 {dimension_numbers = #tpu.dot_dimension_numbers<[1], [0], [0], [1], [0, 0, 1, 1], [], []>} : vector<8x128xbf16>, vector<128x128xbf16>, vector<8x128xf32> -> vector<8x128xf32>
      %20 = arith.addf %11, %19 : vector<8x128xf32>
      %21 = arith.addi %0, %arg6 : i32
      %c0_i32_18 = arith.constant 0 : i32
      %22 = arith.addi %21, %c0_i32_18 : i32
      %c0_19 = arith.constant 0 : index
      %23 = arith.index_cast %22 : i32 to index
      %c2 = arith.constant 2 : index
      %c0_20 = arith.constant 0 : index
      %24 = vector.load %arg3[%c0_19, %23, %c2, %c0_20] : memref<1x10x10x128xbf16, #tpu.memory_space<vmem>>, vector<1x1x8x128xbf16>
      %25 = vector.shape_cast %24 : vector<1x1x8x128xbf16> to vector<8x128xbf16>
      %c0_21 = arith.constant 0 : index
      %c2_22 = arith.constant 2 : index
      %c0_23 = arith.constant 0 : index
      %c0_24 = arith.constant 0 : index
      %26 = vector.load %arg4[%c0_21, %c2_22, %c0_23, %c0_24] : memref<3x3x128x128xbf16, #tpu.memory_space<vmem>>, vector<1x1x128x128xbf16>
      %27 = vector.shape_cast %26 : vector<1x1x128x128xbf16> to vector<128x128xbf16>
      %cst_25 = arith.constant dense<0.000000e+00> : vector<8x128xf32>
      %28 = tpu.matmul %25, %27, %cst_25 {dimension_numbers = #tpu.dot_dimension_numbers<[1], [0], [0], [1], [0, 0, 1, 1], [], []>} : vector<8x128xbf16>, vector<128x128xbf16>, vector<8x128xf32> -> vector<8x128xf32>
      %29 = arith.addf %20, %28 : vector<8x128xf32>
      %30 = arith.addi %0, %arg6 : i32
      %c1_i32_26 = arith.constant 1 : i32
      %31 = arith.addi %30, %c1_i32_26 : i32
      %c0_27 = arith.constant 0 : index
      %32 = arith.index_cast %31 : i32 to index
      %c0_28 = arith.constant 0 : index
      %c0_29 = arith.constant 0 : index
      %33 = vector.load %arg3[%c0_27, %32, %c0_28, %c0_29] : memref<1x10x10x128xbf16, #tpu.memory_space<vmem>>, vector<1x1x8x128xbf16>
      %34 = vector.shape_cast %33 : vector<1x1x8x128xbf16> to vector<8x128xbf16>
      %c1_30 = arith.constant 1 : index
      %c0_31 = arith.constant 0 : index
      %c0_32 = arith.constant 0 : index
      %c0_33 = arith.constant 0 : index
      %35 = vector.load %arg4[%c1_30, %c0_31, %c0_32, %c0_33] : memref<3x3x128x128xbf16, #tpu.memory_space<vmem>>, vector<1x1x128x128xbf16>
      %36 = vector.shape_cast %35 : vector<1x1x128x128xbf16> to vector<128x128xbf16>
      %cst_34 = arith.constant dense<0.000000e+00> : vector<8x128xf32>
      %37 = tpu.matmul %34, %36, %cst_34 {dimension_numbers = #tpu.dot_dimension_numbers<[1], [0], [0], [1], [0, 0, 1, 1], [], []>} : vector<8x128xbf16>, vector<128x128xbf16>, vector<8x128xf32> -> vector<8x128xf32>
      %38 = arith.addf %29, %37 : vector<8x128xf32>
      %39 = arith.addi %0, %arg6 : i32
      %c1_i32_35 = arith.constant 1 : i32
      %40 = arith.addi %39, %c1_i32_35 : i32
      %c0_36 = arith.constant 0 : index
      %41 = arith.index_cast %40 : i32 to index
      %c1_37 = arith.constant 1 : index
      %c0_38 = arith.constant 0 : index
      %42 = vector.load %arg3[%c0_36, %41, %c1_37, %c0_38] : memref<1x10x10x128xbf16, #tpu.memory_space<vmem>>, vector<1x1x8x128xbf16>
      %43 = vector.shape_cast %42 : vector<1x1x8x128xbf16> to vector<8x128xbf16>
      %c1_39 = arith.constant 1 : index
      %c1_40 = arith.constant 1 : index
      %c0_41 = arith.constant 0 : index
      %c0_42 = arith.constant 0 : index
      %44 = vector.load %arg4[%c1_39, %c1_40, %c0_41, %c0_42] : memref<3x3x128x128xbf16, #tpu.memory_space<vmem>>, vector<1x1x128x128xbf16>
      %45 = vector.shape_cast %44 : vector<1x1x128x128xbf16> to vector<128x128xbf16>
      %cst_43 = arith.constant dense<0.000000e+00> : vector<8x128xf32>
      %46 = tpu.matmul %43, %45, %cst_43 {dimension_numbers = #tpu.dot_dimension_numbers<[1], [0], [0], [1], [0, 0, 1, 1], [], []>} : vector<8x128xbf16>, vector<128x128xbf16>, vector<8x128xf32> -> vector<8x128xf32>
      %47 = arith.addf %38, %46 : vector<8x128xf32>
      %48 = arith.addi %0, %arg6 : i32
      %c1_i32_44 = arith.constant 1 : i32
      %49 = arith.addi %48, %c1_i32_44 : i32
      %c0_45 = arith.constant 0 : index
      %50 = arith.index_cast %49 : i32 to index
      %c2_46 = arith.constant 2 : index
      %c0_47 = arith.constant 0 : index
      %51 = vector.load %arg3[%c0_45, %50, %c2_46, %c0_47] : memref<1x10x10x128xbf16, #tpu.memory_space<vmem>>, vector<1x1x8x128xbf16>
      %52 = vector.shape_cast %51 : vector<1x1x8x128xbf16> to vector<8x128xbf16>
      %c1_48 = arith.constant 1 : index
      %c2_49 = arith.constant 2 : index
      %c0_50 = arith.constant 0 : index
      %c0_51 = arith.constant 0 : index
      %53 = vector.load %arg4[%c1_48, %c2_49, %c0_50, %c0_51] : memref<3x3x128x128xbf16, #tpu.memory_space<vmem>>, vector<1x1x128x128xbf16>
      %54 = vector.shape_cast %53 : vector<1x1x128x128xbf16> to vector<128x128xbf16>
      %cst_52 = arith.constant dense<0.000000e+00> : vector<8x128xf32>
      %55 = tpu.matmul %52, %54, %cst_52 {dimension_numbers = #tpu.dot_dimension_numbers<[1], [0], [0], [1], [0, 0, 1, 1], [], []>} : vector<8x128xbf16>, vector<128x128xbf16>, vector<8x128xf32> -> vector<8x128xf32>
      %56 = arith.addf %47, %55 : vector<8x128xf32>
      %57 = arith.addi %0, %arg6 : i32
      %c2_i32 = arith.constant 2 : i32
      %58 = arith.addi %57, %c2_i32 : i32
      %c0_53 = arith.constant 0 : index
      %59 = arith.index_cast %58 : i32 to index
      %c0_54 = arith.constant 0 : index
      %c0_55 = arith.constant 0 : index
      %60 = vector.load %arg3[%c0_53, %59, %c0_54, %c0_55] : memref<1x10x10x128xbf16, #tpu.memory_space<vmem>>, vector<1x1x8x128xbf16>
      %61 = vector.shape_cast %60 : vector<1x1x8x128xbf16> to vector<8x128xbf16>
      %c2_56 = arith.constant 2 : index
      %c0_57 = arith.constant 0 : index
      %c0_58 = arith.constant 0 : index
      %c0_59 = arith.constant 0 : index
      %62 = vector.load %arg4[%c2_56, %c0_57, %c0_58, %c0_59] : memref<3x3x128x128xbf16, #tpu.memory_space<vmem>>, vector<1x1x128x128xbf16>
      %63 = vector.shape_cast %62 : vector<1x1x128x128xbf16> to vector<128x128xbf16>
      %cst_60 = arith.constant dense<0.000000e+00> : vector<8x128xf32>
      %64 = tpu.matmul %61, %63, %cst_60 {dimension_numbers = #tpu.dot_dimension_numbers<[1], [0], [0], [1], [0, 0, 1, 1], [], []>} : vector<8x128xbf16>, vector<128x128xbf16>, vector<8x128xf32> -> vector<8x128xf32>
      %65 = arith.addf %56, %64 : vector<8x128xf32>
      %66 = arith.addi %0, %arg6 : i32
      %c2_i32_61 = arith.constant 2 : i32
      %67 = arith.addi %66, %c2_i32_61 : i32
      %c0_62 = arith.constant 0 : index
      %68 = arith.index_cast %67 : i32 to index
      %c1_63 = arith.constant 1 : index
      %c0_64 = arith.constant 0 : index
      %69 = vector.load %arg3[%c0_62, %68, %c1_63, %c0_64] : memref<1x10x10x128xbf16, #tpu.memory_space<vmem>>, vector<1x1x8x128xbf16>
      %70 = vector.shape_cast %69 : vector<1x1x8x128xbf16> to vector<8x128xbf16>
      %c2_65 = arith.constant 2 : index
      %c1_66 = arith.constant 1 : index
      %c0_67 = arith.constant 0 : index
      %c0_68 = arith.constant 0 : index
      %71 = vector.load %arg4[%c2_65, %c1_66, %c0_67, %c0_68] : memref<3x3x128x128xbf16, #tpu.memory_space<vmem>>, vector<1x1x128x128xbf16>
      %72 = vector.shape_cast %71 : vector<1x1x128x128xbf16> to vector<128x128xbf16>
      %cst_69 = arith.constant dense<0.000000e+00> : vector<8x128xf32>
      %73 = tpu.matmul %70, %72, %cst_69 {dimension_numbers = #tpu.dot_dimension_numbers<[1], [0], [0], [1], [0, 0, 1, 1], [], []>} : vector<8x128xbf16>, vector<128x128xbf16>, vector<8x128xf32> -> vector<8x128xf32>
      %74 = arith.addf %65, %73 : vector<8x128xf32>
      %75 = arith.addi %0, %arg6 : i32
      %c2_i32_70 = arith.constant 2 : i32
      %76 = arith.addi %75, %c2_i32_70 : i32
      %c0_71 = arith.constant 0 : index
      %77 = arith.index_cast %76 : i32 to index
      %c2_72 = arith.constant 2 : index
      %c0_73 = arith.constant 0 : index
      %78 = vector.load %arg3[%c0_71, %77, %c2_72, %c0_73] : memref<1x10x10x128xbf16, #tpu.memory_space<vmem>>, vector<1x1x8x128xbf16>
      %79 = vector.shape_cast %78 : vector<1x1x8x128xbf16> to vector<8x128xbf16>
      %c2_74 = arith.constant 2 : index
      %c2_75 = arith.constant 2 : index
      %c0_76 = arith.constant 0 : index
      %c0_77 = arith.constant 0 : index
      %80 = vector.load %arg4[%c2_74, %c2_75, %c0_76, %c0_77] : memref<3x3x128x128xbf16, #tpu.memory_space<vmem>>, vector<1x1x128x128xbf16>
      %81 = vector.shape_cast %80 : vector<1x1x128x128xbf16> to vector<128x128xbf16>
      %cst_78 = arith.constant dense<0.000000e+00> : vector<8x128xf32>
      %82 = tpu.matmul %79, %81, %cst_78 {dimension_numbers = #tpu.dot_dimension_numbers<[1], [0], [0], [1], [0, 0, 1, 1], [], []>} : vector<8x128xbf16>, vector<128x128xbf16>, vector<8x128xf32> -> vector<8x128xf32>
      %83 = arith.addf %74, %82 : vector<8x128xf32>
      %cst_79 = arith.constant 0.000000e+00 : f32
      %84 = vector.broadcast %cst_79 : f32 to vector<8x128xf32>
      %85 = arith.cmpf oge, %83, %84 : vector<8x128xf32>
      %cst_80 = arith.constant 2.000000e-01 : f32
      %86 = vector.broadcast %cst_80 : f32 to vector<8x128xf32>
      %87 = arith.mulf %86, %83 : vector<8x128xf32>
      %88 = arith.select %85, %83, %87 : vector<8x128xi1>, vector<8x128xf32>
      %89 = arith.truncf %88 : vector<8x128xf32> to vector<8x128xbf16>
      %c0_81 = arith.constant 0 : index
      %90 = arith.index_cast %arg6 : i32 to index
      %c0_82 = arith.constant 0 : index
      %c0_83 = arith.constant 0 : index
      %91 = vector.load %arg5[%c0_81, %90, %c0_82, %c0_83] : memref<1x8x8x128xbf16, #tpu.memory_space<vmem>>, vector<1x1x8x128xbf16>
      %92 = vector.shape_cast %91 : vector<1x1x8x128xbf16> to vector<8x128xbf16>
      %93 = vector.shape_cast %89 : vector<8x128xbf16> to vector<1x1x8x128xbf16>
      tpu.vector_store %arg5[%c0_81, %90, %c0_82, %c0_83], %93 {strides = array<i32>} : memref<1x8x8x128xbf16, #tpu.memory_space<vmem>>, vector<1x1x8x128xbf16>,
    }
    %c8_i32_1 = arith.constant 8 : i32
    return
  }
  func.func @transform_0(%arg0: i32, %arg1: i32, %arg2: i32) -> (i32, i32, i32, i32) {
    %c0_i32 = arith.constant 0 : i32
    %c0_i32_0 = arith.constant 0 : i32
    %c0_i32_1 = arith.constant 0 : i32
    %c0_i32_2 = arith.constant 0 : i32
    return %arg1, %c0_i32, %c0_i32_0, %c0_i32_1 : i32, i32, i32, i32
  }
  func.func @transform_1(%arg0: i32, %arg1: i32, %arg2: i32) -> (i32, i32, i32, i32) {
    %c0_i32 = arith.constant 0 : i32
    %c0_i32_0 = arith.constant 0 : i32
    %c0_i32_1 = arith.constant 0 : i32
    %c0_i32_2 = arith.constant 0 : i32
    return %c0_i32, %c0_i32_0, %c0_i32_1, %arg0 : i32, i32, i32, i32
  }
  func.func @transform_2(%arg0: i32, %arg1: i32, %arg2: i32) -> (i32, i32, i32, i32) {
    %c0_i32 = arith.constant 0 : i32
    %c0_i32_0 = arith.constant 0 : i32
    return %arg1, %arg2, %c0_i32, %arg0 : i32, i32, i32, i32
  }
}

module attributes {stable_mosaic.version = 11 : i64} {
  func.func @_conv_tap_kernel(%arg0: i32, %arg1: i32, %arg2: i32, %arg3: memref<1x5x5x512xbf16, #tpu.memory_space<vmem>>, %arg4: memref<2x2x512x128xbf16, #tpu.memory_space<vmem>>, %arg5: memref<1x4x4x128xbf16, #tpu.memory_space<vmem>>) attributes {dimension_semantics = [#tpu.dimension_semantics<parallel>, #tpu.dimension_semantics<parallel>, #tpu.dimension_semantics<parallel>], iteration_bounds = array<i64: 1, 2, 1>, scalar_prefetch = 0 : i64, scratch_operands = 0 : i64, tpu.core_type = #tpu.core_type<tc>, window_params = [{transform_indices = @transform_0, window_bounds = array<i64: 1, 5, 5, 512>}, {transform_indices = @transform_1, window_bounds = array<i64: 2, 2, 512, 128>}, {transform_indices = @transform_2, window_bounds = array<i64: 1, 4, 4, 128>}]} {
    %c4_i32 = arith.constant 4 : i32
    %0 = arith.muli %arg2, %c4_i32 : i32
    %c0_i32 = arith.constant 0 : i32
    %c4_i32_0 = arith.constant 4 : i32
    %1 = arith.addi %c0_i32, %c4_i32_0 : i32
    %c1_i32 = arith.constant 1 : i32
    scf.for %arg6 = %c0_i32 to %1 step %c1_i32  : i32 {
      %cst = arith.constant 0.000000e+00 : f32
      %2 = vector.broadcast %cst : f32 to vector<4x128xf32>
      %3 = arith.addi %0, %arg6 : i32
      %c0_i32_2 = arith.constant 0 : i32
      %4 = arith.addi %3, %c0_i32_2 : i32
      %c0 = arith.constant 0 : index
      %5 = arith.index_cast %4 : i32 to index
      %c0_3 = arith.constant 0 : index
      %c0_4 = arith.constant 0 : index
      %6 = vector.load %arg3[%c0, %5, %c0_3, %c0_4] : memref<1x5x5x512xbf16, #tpu.memory_space<vmem>>, vector<1x1x4x512xbf16>
      %7 = vector.shape_cast %6 : vector<1x1x4x512xbf16> to vector<4x512xbf16>
      %c0_5 = arith.constant 0 : index
      %c0_6 = arith.constant 0 : index
      %c0_7 = arith.constant 0 : index
      %c0_8 = arith.constant 0 : index
      %8 = vector.load %arg4[%c0_5, %c0_6, %c0_7, %c0_8] : memref<2x2x512x128xbf16, #tpu.memory_space<vmem>>, vector<1x1x512x128xbf16>
      %9 = vector.shape_cast %8 : vector<1x1x512x128xbf16> to vector<512x128xbf16>
      %cst_9 = arith.constant dense<0.000000e+00> : vector<4x128xf32>
      %10 = tpu.matmul %7, %9, %cst_9 {dimension_numbers = #tpu.dot_dimension_numbers<[1], [0], [0], [1], [0, 0, 1, 1], [], []>} : vector<4x512xbf16>, vector<512x128xbf16>, vector<4x128xf32> -> vector<4x128xf32>
      %11 = arith.addf %2, %10 : vector<4x128xf32>
      %12 = arith.addi %0, %arg6 : i32
      %c0_i32_10 = arith.constant 0 : i32
      %13 = arith.addi %12, %c0_i32_10 : i32
      %c0_11 = arith.constant 0 : index
      %14 = arith.index_cast %13 : i32 to index
      %c1 = arith.constant 1 : index
      %c0_12 = arith.constant 0 : index
      %15 = vector.load %arg3[%c0_11, %14, %c1, %c0_12] : memref<1x5x5x512xbf16, #tpu.memory_space<vmem>>, vector<1x1x4x512xbf16>
      %16 = vector.shape_cast %15 : vector<1x1x4x512xbf16> to vector<4x512xbf16>
      %c0_13 = arith.constant 0 : index
      %c1_14 = arith.constant 1 : index
      %c0_15 = arith.constant 0 : index
      %c0_16 = arith.constant 0 : index
      %17 = vector.load %arg4[%c0_13, %c1_14, %c0_15, %c0_16] : memref<2x2x512x128xbf16, #tpu.memory_space<vmem>>, vector<1x1x512x128xbf16>
      %18 = vector.shape_cast %17 : vector<1x1x512x128xbf16> to vector<512x128xbf16>
      %cst_17 = arith.constant dense<0.000000e+00> : vector<4x128xf32>
      %19 = tpu.matmul %16, %18, %cst_17 {dimension_numbers = #tpu.dot_dimension_numbers<[1], [0], [0], [1], [0, 0, 1, 1], [], []>} : vector<4x512xbf16>, vector<512x128xbf16>, vector<4x128xf32> -> vector<4x128xf32>
      %20 = arith.addf %11, %19 : vector<4x128xf32>
      %21 = arith.addi %0, %arg6 : i32
      %c1_i32_18 = arith.constant 1 : i32
      %22 = arith.addi %21, %c1_i32_18 : i32
      %c0_19 = arith.constant 0 : index
      %23 = arith.index_cast %22 : i32 to index
      %c0_20 = arith.constant 0 : index
      %c0_21 = arith.constant 0 : index
      %24 = vector.load %arg3[%c0_19, %23, %c0_20, %c0_21] : memref<1x5x5x512xbf16, #tpu.memory_space<vmem>>, vector<1x1x4x512xbf16>
      %25 = vector.shape_cast %24 : vector<1x1x4x512xbf16> to vector<4x512xbf16>
      %c1_22 = arith.constant 1 : index
      %c0_23 = arith.constant 0 : index
      %c0_24 = arith.constant 0 : index
      %c0_25 = arith.constant 0 : index
      %26 = vector.load %arg4[%c1_22, %c0_23, %c0_24, %c0_25] : memref<2x2x512x128xbf16, #tpu.memory_space<vmem>>, vector<1x1x512x128xbf16>
      %27 = vector.shape_cast %26 : vector<1x1x512x128xbf16> to vector<512x128xbf16>
      %cst_26 = arith.constant dense<0.000000e+00> : vector<4x128xf32>
      %28 = tpu.matmul %25, %27, %cst_26 {dimension_numbers = #tpu.dot_dimension_numbers<[1], [0], [0], [1], [0, 0, 1, 1], [], []>} : vector<4x512xbf16>, vector<512x128xbf16>, vector<4x128xf32> -> vector<4x128xf32>
      %29 = arith.addf %20, %28 : vector<4x128xf32>
      %30 = arith.addi %0, %arg6 : i32
      %c1_i32_27 = arith.constant 1 : i32
      %31 = arith.addi %30, %c1_i32_27 : i32
      %c0_28 = arith.constant 0 : index
      %32 = arith.index_cast %31 : i32 to index
      %c1_29 = arith.constant 1 : index
      %c0_30 = arith.constant 0 : index
      %33 = vector.load %arg3[%c0_28, %32, %c1_29, %c0_30] : memref<1x5x5x512xbf16, #tpu.memory_space<vmem>>, vector<1x1x4x512xbf16>
      %34 = vector.shape_cast %33 : vector<1x1x4x512xbf16> to vector<4x512xbf16>
      %c1_31 = arith.constant 1 : index
      %c1_32 = arith.constant 1 : index
      %c0_33 = arith.constant 0 : index
      %c0_34 = arith.constant 0 : index
      %35 = vector.load %arg4[%c1_31, %c1_32, %c0_33, %c0_34] : memref<2x2x512x128xbf16, #tpu.memory_space<vmem>>, vector<1x1x512x128xbf16>
      %36 = vector.shape_cast %35 : vector<1x1x512x128xbf16> to vector<512x128xbf16>
      %cst_35 = arith.constant dense<0.000000e+00> : vector<4x128xf32>
      %37 = tpu.matmul %34, %36, %cst_35 {dimension_numbers = #tpu.dot_dimension_numbers<[1], [0], [0], [1], [0, 0, 1, 1], [], []>} : vector<4x512xbf16>, vector<512x128xbf16>, vector<4x128xf32> -> vector<4x128xf32>
      %38 = arith.addf %29, %37 : vector<4x128xf32>
      %cst_36 = arith.constant 0.000000e+00 : f32
      %39 = vector.broadcast %cst_36 : f32 to vector<4x128xf32>
      %40 = arith.cmpf oge, %38, %39 : vector<4x128xf32>
      %cst_37 = arith.constant 2.000000e-01 : f32
      %41 = vector.broadcast %cst_37 : f32 to vector<4x128xf32>
      %42 = arith.mulf %41, %38 : vector<4x128xf32>
      %43 = arith.select %40, %38, %42 : vector<4x128xi1>, vector<4x128xf32>
      %44 = arith.truncf %43 : vector<4x128xf32> to vector<4x128xbf16>
      %c0_38 = arith.constant 0 : index
      %45 = arith.index_cast %arg6 : i32 to index
      %c0_39 = arith.constant 0 : index
      %c0_40 = arith.constant 0 : index
      %46 = vector.load %arg5[%c0_38, %45, %c0_39, %c0_40] : memref<1x4x4x128xbf16, #tpu.memory_space<vmem>>, vector<1x1x4x128xbf16>
      %47 = vector.shape_cast %46 : vector<1x1x4x128xbf16> to vector<4x128xbf16>
      %48 = vector.shape_cast %44 : vector<4x128xbf16> to vector<1x1x4x128xbf16>
      tpu.vector_store %arg5[%c0_38, %45, %c0_39, %c0_40], %48 {strides = array<i32>} : memref<1x4x4x128xbf16, #tpu.memory_space<vmem>>, vector<1x1x4x128xbf16>,
    }
    %c4_i32_1 = arith.constant 4 : i32
    return
  }
  func.func @transform_0(%arg0: i32, %arg1: i32, %arg2: i32) -> (i32, i32, i32, i32) {
    %c0_i32 = arith.constant 0 : i32
    %c0_i32_0 = arith.constant 0 : i32
    %c0_i32_1 = arith.constant 0 : i32
    %c0_i32_2 = arith.constant 0 : i32
    return %arg1, %c0_i32, %c0_i32_0, %c0_i32_1 : i32, i32, i32, i32
  }
  func.func @transform_1(%arg0: i32, %arg1: i32, %arg2: i32) -> (i32, i32, i32, i32) {
    %c0_i32 = arith.constant 0 : i32
    %c0_i32_0 = arith.constant 0 : i32
    %c0_i32_1 = arith.constant 0 : i32
    %c0_i32_2 = arith.constant 0 : i32
    return %c0_i32, %c0_i32_0, %c0_i32_1, %arg0 : i32, i32, i32, i32
  }
  func.func @transform_2(%arg0: i32, %arg1: i32, %arg2: i32) -> (i32, i32, i32, i32) {
    %c0_i32 = arith.constant 0 : i32
    %c0_i32_0 = arith.constant 0 : i32
    return %arg1, %arg2, %c0_i32, %arg0 : i32, i32, i32, i32
  }
}

module attributes {stable_mosaic.version = 11 : i64} {
  func.func @_final_mean_kernel(%arg0: i32, %arg1: memref<8x2048xbf16, #tpu.memory_space<vmem>>, %arg2: memref<1x2048xbf16, #tpu.memory_space<vmem>>, %arg3: memref<1x1xf32, #tpu.memory_space<vmem>>, %arg4: memref<1x1xf32, #tpu.memory_space<vmem>>) attributes {dimension_semantics = [#tpu.dimension_semantics<arbitrary>], iteration_bounds = array<i64: 1>, scalar_prefetch = 0 : i64, scratch_operands = 1 : i64, tpu.core_type = #tpu.core_type<tc>, window_params = [{transform_indices = @transform_0, window_bounds = array<i64: 8, 2048>}, {pipeline_mode = #tpu.pipeline_mode<synchronous>, transform_indices = @transform_1, window_bounds = array<i64: 1, 2048>}, {pipeline_mode = #tpu.pipeline_mode<synchronous>, transform_indices = @transform_2, window_bounds = array<i64: 1, 1>}]} {
    %c0_i32 = arith.constant 0 : i32
    %0 = arith.cmpi eq, %arg0, %c0_i32 : i32
    %1 = arith.extui %0 : i1 to i32
    %c0_i32_0 = arith.constant 0 : i32
    %2 = arith.cmpi ne, %1, %c0_i32_0 : i32
    scf.if %2 {
      %cst_11 = arith.constant 0.000000e+00 : f32
      %19 = vector.broadcast %cst_11 : f32 to vector<1x1xf32>
      %c0_12 = arith.constant 0 : index
      %c0_13 = arith.constant 0 : index
      %20 = vector.load %arg4[%c0_12, %c0_13] : memref<1x1xf32, #tpu.memory_space<vmem>>, vector<1x1xf32>
      tpu.vector_store %arg4[%c0_12, %c0_13], %19 {strides = array<i32>} : memref<1x1xf32, #tpu.memory_space<vmem>>, vector<1x1xf32>,
    } else {
    }
    %c0 = arith.constant 0 : index
    %c0_1 = arith.constant 0 : index
    %3 = vector.load %arg1[%c0, %c0_1] : memref<8x2048xbf16, #tpu.memory_space<vmem>>, vector<8x2048xbf16>
    %4 = arith.extf %3 : vector<8x2048xbf16> to vector<8x2048xf32>
    %c0_2 = arith.constant 0 : index
    %c0_3 = arith.constant 0 : index
    %5 = vector.load %arg2[%c0_2, %c0_3] : memref<1x2048xbf16, #tpu.memory_space<vmem>>, vector<1x2048xbf16>
    %6 = arith.extf %5 : vector<1x2048xbf16> to vector<1x2048xf32>
    %7 = vector.broadcast %6 : vector<1x2048xf32> to vector<8x2048xf32>
    %8 = arith.mulf %4, %7 : vector<8x2048xf32>
    %cst = arith.constant dense<0.000000e+00> : vector<8xf32>
    %9 = vector.multi_reduction <add>, %8, %cst [1] : vector<8x2048xf32> to vector<8xf32>
    %10 = vector.shape_cast %9 : vector<8xf32> to vector<8x1xf32>
    %c0_4 = arith.constant 0 : index
    %c0_5 = arith.constant 0 : index
    %11 = vector.load %arg4[%c0_4, %c0_5] : memref<1x1xf32, #tpu.memory_space<vmem>>, vector<1x1xf32>
    %cst_6 = arith.constant dense<0.000000e+00> : vector<1xf32>
    %12 = vector.multi_reduction <add>, %10, %cst_6 [0] : vector<8x1xf32> to vector<1xf32>
    %13 = vector.shape_cast %12 : vector<1xf32> to vector<1x1xf32>
    %14 = arith.addf %11, %13 : vector<1x1xf32>
    %c0_7 = arith.constant 0 : index
    %c0_8 = arith.constant 0 : index
    %15 = vector.load %arg4[%c0_7, %c0_8] : memref<1x1xf32, #tpu.memory_space<vmem>>, vector<1x1xf32>
    tpu.vector_store %arg4[%c0_7, %c0_8], %14 {strides = array<i32>} : memref<1x1xf32, #tpu.memory_space<vmem>>, vector<1x1xf32>,
    %c0_i32_9 = arith.constant 0 : i32
    %16 = arith.cmpi eq, %arg0, %c0_i32_9 : i32
    %17 = arith.extui %16 : i1 to i32
    %c0_i32_10 = arith.constant 0 : i32
    %18 = arith.cmpi ne, %17, %c0_i32_10 : i32
    scf.if %18 {
      %c0_11 = arith.constant 0 : index
      %c0_12 = arith.constant 0 : index
      %19 = vector.load %arg4[%c0_11, %c0_12] : memref<1x1xf32, #tpu.memory_space<vmem>>, vector<1x1xf32>
      %cst_13 = arith.constant 5.000000e-01 : f32
      %20 = vector.broadcast %cst_13 : f32 to vector<1x1xf32>
      %21 = arith.mulf %19, %20 : vector<1x1xf32>
      %c0_14 = arith.constant 0 : index
      %c0_15 = arith.constant 0 : index
      %22 = vector.load %arg3[%c0_14, %c0_15] : memref<1x1xf32, #tpu.memory_space<vmem>>, vector<1x1xf32>
      tpu.vector_store %arg3[%c0_14, %c0_15], %21 {strides = array<i32>} : memref<1x1xf32, #tpu.memory_space<vmem>>, vector<1x1xf32>,
    } else {
    }
    return
  }
  func.func @transform_0(%arg0: i32) -> (i32, i32) {
    %c0_i32 = arith.constant 0 : i32
    %c0_i32_0 = arith.constant 0 : i32
    return %arg0, %c0_i32 : i32, i32
  }
  func.func @transform_1(%arg0: i32) -> (i32, i32) {
    %c0_i32 = arith.constant 0 : i32
    %c0_i32_0 = arith.constant 0 : i32
    %c0_i32_1 = arith.constant 0 : i32
    return %c0_i32, %c0_i32_0 : i32, i32
  }
  func.func @transform_2(%arg0: i32) -> (i32, i32) {
    %c0_i32 = arith.constant 0 : i32
    %c0_i32_0 = arith.constant 0 : i32
    %c0_i32_1 = arith.constant 0 : i32
    return %c0_i32, %c0_i32_0 : i32, i32
  }
}

</mosaic_0001>

<bundles_post_ra>
// kernel: _lambda_.4
= control target key start
LH: loop header
LB: loop body
LE: loop exit
PB: predicated region body
PF: predicated region fallthrough
CT: control target
= control target key end

     0   :  { %s753_s9 = smov 0   ;;  %s755_s10 = smov 0   ;;  %s822_s0 = inlined_call_operand.vmem [shape: bf16[2,9,9,16], index: 0, kind: input, shape index: {}]   ;;  %s823_s1 = inlined_call_operand.vmem [shape: bf16[2,2,16,128], index: 1, kind: input, shape index: {}]   ;;  %s824_s2 = inlined_call_operand.vmem [shape: bf16[2,8,8,128], index: 2, kind: output, shape index: {}]  }
   0x1   :  { %s757_s11 = smov 0  }
   0x2 LB: > { %s27_s12 = sadd.s32 1, %s726_s10  ;;  %p591_p0 = scmp.ge.s32.totalorder %s730_s11, 1  ;;  %s730_s11 = sphi %s757_s11, %s12_s11   ;;  %s726_s10 = sphi %s755_s10, %s826_s10   ;;  %s722_s9 = sphi %s753_s9, %s825_s9  }
   0x3   : > { %p29_p1 = scmp.ge.s32.totalorder %s27_s12, 2  ;;  %p144_p2 = scmp.lt.s32.totalorder %s730_s11, 3 }
   0x5   : > { %s828_s12 = smov (%p29_p1, %s27_s12), 0  ;;  %p145_p3 = pnand %p591_p0, %p144_p2 }
   0x6   : > { %p177_p4 = scmp.lt.s32.totalorder (!%p145_p3), %s722_s9, 1  ;;  %s781_s21 = smov (!%p145_p3), 0  }
   0x7   : > { %148 = sbr.rel (%p145_p3) target bundleno = 261 (0x105), region = 28 }
   0xe   : > { %s830_s9 = smov (!%p177_p4, %s722_s9), 1 }
   0xf   : > { %s663_s13 = smul.u32 72, %s830_s9  ;;  %s620_s14 = sshll.u32 %s830_s9, 5 }
  0x10   : > { %s774_s17 = scalar_lea.vmem %s824_s2, %s620_s14 }
  0x11   : > { %s779_s20 = scalar_lea.vmem %s822_s0, %s663_s13 }
  0x12 LB: >> { %v698_v0 = vld [vmem:[%s823_s1 + $0x10] sm:$0xff]   ;;  %v736_v1 = vmov 0.0   ;;  %vm236_vm0 = vcmask 130048   ;;  %vm737_vm1 = vmmov 0   ;;  %s621_s24 = sshll.u32 %s734_s21, 3  ;;  %v699_v2 = vld [vmem:[%s823_s1 + $0x8] sm:$0xff]   ;;  %s734_s21 = sphi %s781_s21, %s206_s21  }
  0x13   : >> { %642 = vmatprep.subr.bf16.mxu0 %v736_v1  ;;  %630 = vmatprep.subr.bf16.mxu1 %v736_v1  ;;  %s210_s27 = scalar_lea.vmem %s779_s20, %s621_s24  ;;  %v702_v6 = vld [vmem:[%s823_s1 + $0x18] sm:$0xff]   ;;  %v701_v15 = vld [vmem:[%s823_s1] sm:$0xff]   ;;  %s617_s4 = sshll.u32 %s734_s21, 2 }
  0x14   : >> { %643 = vmatpush3.bf16.msra.mxu0 %v698_v0  ;;  %644 = vmatprep.mubr.msk.bf16.mxu0 %vm737_vm1, %v736_v1  ;;  %v605_v3 = vld [vmem:[%s210_s27 + $0x8] sm:$0xf]  ;;  %v211_v4 = vld [vmem:[%s210_s27] sm:$0xf]  ;;  %v214_v5 = vld [vmem:[%s210_s27 + $0x4] sm:$0x1]  ;;  %s459_s5 = scalar_lea.vmem %s774_s17, %s617_s4 }
  0x15   : >> { %632 = vmatprep.mubr.msk.bf16.mxu1 %vm737_vm1, %v736_v1  ;;  %648 = vmatprep.subr.bf16.mxu0 %v736_v1  ;;  %v599_v7 = vcombine.low %v211_v4, %v214_v5  ;;  %v703_v8 = vld [vmem:[%s210_s27 + $0x8] sm:$0x1f]   ;;  %s206_s21 = sadd.s32 1, %s734_s21  }
  0x16   : >> { %631 = vmatpush3.bf16.msra.mxu1 %v699_v2  ;;  %v400_v11 = vshll.u32 %v703_v8, 16  ;;  %v398_v12 = vshrl.u32 %v703_v8, 16  ;;  %p203_p5 = scmp.ge.s32.totalorder %s206_s21, 8  }
  0x17   : >> { %645 = vmatmul.mubr.msk.bf16.vlgmr.msra.gmra.mrb[0].mxu0 %vm236_vm0, %v605_v3  ;;  %636 = vmatprep.subr.bf16.mxu1 %v736_v1  ;;  %v224_v9 = vshrl.u32 %v599_v7, 16  ;;  %v226_v10 = vshll.u32 %v599_v7, 16 }
  0x18   : >> { %650 = vmatprep.mubr.msk.bf16.mxu0 %vm737_vm1, %v736_v1  ;;  %649 = vmatpush3.bf16.msra.mxu0 %v702_v6  ;;  %v402_v14 = vrot.slane %v400_v11, 1 }
  0x19   : >> { %v228_v13 = vrot.slane %v226_v10, 1 }
  0x1a   : >> { %v403_v17 = vor.u32 %v402_v14, %v398_v12 }
  0x1b   : >> { %v229_v16 = vor.u32 %v228_v13, %v224_v9 }
  0x1d   : >> { %633 = vmatmul.mubr.msk.bf16.vlgmr.msra.gmra.mrb[0].mxu1 %vm236_vm0, %v229_v16 }
  0x1e   : >> { %637 = vmatpush3.bf16.msra.mxu1 %v701_v15  ;;  %638 = vmatprep.mubr.msk.bf16.mxu1 %vm737_vm1, %v736_v1 }
  0x23   : >> { %651 = vmatmul.mubr.msk.bf16.vlgmr.msra.gmra.mrb[0].mxu0 %vm236_vm0, %v403_v17 }
  0x29   : >> { %639 = vmatmul.mubr.msk.bf16.vlgmr.msra.gmra.mrb[0].mxu1 %vm236_vm0, %v211_v4 }
  0xf6   : >> { %v447_v18 = vpop.f32.mrb[0].mxu0 }
  0xf7   : >> { %v652_v19 = vpop.f32.mrb[1].mxu0 }
  0xf8   : >> { %v450_v20 = vpop.f32.mrb[2].mxu0 }
  0xf9   : >> { %v653_v21 = vpop.f32.mrb[3].mxu0 }
  0xfc   : >> { %v323_v22 = vpop.f32.mrb[0].mxu1 }
  0xfd   : >> { %v654_v23 = vadd.f32 %v447_v18, %v323_v22  ;;  %v640_v24 = vpop.f32.mrb[1].mxu1 }
  0xfe   : >> { %v326_v25 = vpop.f32.mrb[2].mxu1  ;;  %205 = sbr.rel (!%p203_p5) target bundleno = 18 (0x12), region = 74 }
  0xff   : >> { %vm454_vm2 = vcmp.ge.f32.partialorder %v654_v23, 0.0  ;;  %v455_v26 = vmul.f32 0.2, %v654_v23  ;;  %v641_v27 = vpop.f32.mrb[3].mxu1 }
 0x101   : >> { %v456_v28 = vsel %vm454_vm2, %v654_v23, %v455_v26 }
 0x102   : >> { %v457_v29 = vpack.c.bf16 %v456_v28, %v456_v28 }
 0x104   : >> { %460 = vst [vmem:[%s459_s5] sm:$0xf] %v457_v29 }
 0x105 PF: > { %s12_s11 = sadd.s32 1, %s730_s11   ;;  %s825_s9 = smov %s726_s10 }
 0x106   : > { %p9_p6 = scmp.ge.s32.totalorder %s12_s11, 4   ;;  %s826_s10 = smov %s828_s12 }
 0x108   :  { %11 = sbr.rel (!%p9_p6) target bundleno = 2 (0x2), region = 85 }

// kernel: _lambda_.5
= control target key start
LH: loop header
LB: loop body
LE: loop exit
PB: predicated region body
PF: predicated region fallthrough
CT: control target
= control target key end

     0   :  { %s2056_s9 = smov 0   ;;  %s2058_s10 = smov 0   ;;  %s2442_s0 = inlined_call_operand.vmem [shape: bf16[2,10,10,128], index: 0, kind: input, shape index: {}]   ;;  %s2443_s1 = inlined_call_operand.vmem [shape: bf16[3,3,128,128], index: 1, kind: input, shape index: {}]   ;;  %s2444_s2 = inlined_call_operand.vmem [shape: bf16[2,8,8,128], index: 2, kind: output, shape index: {}]  }
   0x1   :  { %s2060_s11 = smov 0  }
   0x2 LB: > { %s27_s12 = sadd.s32 1, %s2029_s10  ;;  %p1377_p0 = scmp.ge.s32.totalorder %s2033_s11, 1  ;;  %s2033_s11 = sphi %s2060_s11, %s12_s11   ;;  %s2029_s10 = sphi %s2058_s10, %s2446_s10   ;;  %s2025_s9 = sphi %s2056_s9, %s2445_s9  }
   0x3   : > { %p29_p1 = scmp.ge.s32.totalorder %s27_s12, 2  ;;  %p144_p2 = scmp.lt.s32.totalorder %s2033_s11, 3 }
   0x5   : > { %s2448_s12 = smov (%p29_p1, %s27_s12), 0  ;;  %p145_p3 = pnand %p1377_p0, %p144_p2 }
   0x6   : > { %p177_p4 = scmp.lt.s32.totalorder (!%p145_p3), %s2025_s9, 1  ;;  %s2084_s21 = smov (!%p145_p3), 0  }
   0x7   : > { %148 = sbr.rel (%p145_p3) target bundleno = 400 (0x190), region = 28 }
   0xe   : > { %s2450_s9 = smov (!%p177_p4, %s2025_s9), 1 }
   0xf   : > { %s1894_s13 = smul.u32 80, %s2450_s9  ;;  %s1602_s14 = sshll.u32 %s2450_s9, 5 }
  0x10   : > { %s2077_s17 = scalar_lea.vmem %s2444_s2, %s1602_s14 }
  0x11   : > { %s2082_s20 = scalar_lea.vmem %s2442_s0, %s1894_s13 }
  0x12 LB: >> { %v1929_v0 = vld [vmem:[%s2443_s1 + $0x40] sm:$0xff]   ;;  %v2039_v1 = vmov 0.0   ;;  %v1931_v3 = vld [vmem:[%s2443_s1 + $0x48] sm:$0xff]   ;;  %vm2040_vm0 = vmmov 0   ;;  %v1933_v5 = vld [vmem:[%s2443_s1 + $0x50] sm:$0xff]   ;;  %s1603_s8 = sshll.u32 %s2037_s21, 3  ;;  %s2037_s21 = sphi %s2084_s21, %s206_s21  }
  0x13   : >> { %1685 = vmatprep.subr.bf16.mxu1 %v2039_v1  ;;  %1765 = vmatprep.subr.bf16.mxu0 %v2039_v1  ;;  %v1930_v2 = vld [vmem:[%s2443_s1 + $0x100] sm:$0xff]   ;;  %v1932_v4 = vld [vmem:[%s2443_s1 + $0x108] sm:$0xff]   ;;  %v1934_v6 = vld [vmem:[%s2443_s1 + $0x110] sm:$0xff]   ;;  %s2127_s14 = scalar_lea.vmem %s2082_s20, %s1603_s8 }
  0x14   : >> { %1686 = vmatpush3.bf16.msra.mxu1 %v1929_v0  ;;  %1701 = vmatprep.mubr.msk.bf16.mxu1 %vm2040_vm0, %v2039_v1  ;;  %v1935_v7 = vld [vmem:[%s2443_s1 + $0x58] sm:$0xff]   ;;  %v1937_v9 = vld [vmem:[%s2443_s1 + $0x60] sm:$0xff]   ;;  %v1939_v13 = vld [vmem:[%s2443_s1 + $0x68] sm:$0xff]  }
  0x15   : >> { %1766 = vmatpush3.bf16.msra.mxu0 %v1930_v2  ;;  %1687 = vmatprep.subr.bf16.mxu1 %v2039_v1  ;;  %v1936_v8 = vld [vmem:[%s2443_s1 + $0x118] sm:$0xff]   ;;  %v1938_v10 = vld [vmem:[%s2443_s1 + $0x120] sm:$0xff]   ;;  %v1467_v15 = vld [vmem:[%s2127_s14 + $0x8] sm:$0xf] }
  0x16   : >> { %1767 = vmatprep.subr.bf16.mxu0 %v2039_v1  ;;  %1781 = vmatprep.mubr.msk.bf16.mxu0 %vm2040_vm0, %v2039_v1  ;;  %v2138_v11 = vld [vmem:[%s2127_s14] sm:$0xf]  ;;  %v2141_v12 = vld [vmem:[%s2127_s14 + $0x4] sm:$0x1]  ;;  %v2150_v16 = vld [vmem:[%s2127_s14 + $0xc] sm:$0x1] }
  0x17   : >> { %v1399_v14 = vcombine.low %v2138_v11, %v2141_v12  ;;  %v1940_v17 = vld [vmem:[%s2443_s1 + $0x128] sm:$0xff]   ;;  %v1485_v18 = vcombine.low %v1467_v15, %v2150_v16  ;;  %v1941_v20 = vld [vmem:[%s2443_s1 + $0x70] sm:$0xff]   ;;  %v1943_v23 = vld [vmem:[%s2443_s1 + $0x78] sm:$0xff]  }
  0x18   : >> { %1688 = vmatpush3.bf16.msra.mxu1 %v1931_v3  ;;  %v1942_v22 = vld [vmem:[%s2443_s1 + $0x130] sm:$0xff]   ;;  %v1944_v28 = vld [vmem:[%s2443_s1 + $0x138] sm:$0xff]   ;;  %v1946_v30 = vld [vmem:[%s2443_s1] sm:$0xff]  }
  0x19   : >> { %1768 = vmatpush3.bf16.msra.mxu0 %v1932_v4  ;;  %1689 = vmatprep.subr.bf16.mxu1 %v2039_v1  ;;  %v254_v19 = vshll.u32 %v1399_v14, 16  ;;  %v685_v21 = vshll.u32 %v1485_v18, 16  ;;  %v252_v24 = vshrl.u32 %v1399_v14, 16  ;;  %v683_v26 = vshrl.u32 %v1485_v18, 16  ;;  %v1948_v32 = vld [vmem:[%s2443_s1 + $0x140] sm:$0xff]   ;;  %v1949_v33 = vld [vmem:[%s2443_s1 + $0x8] sm:$0xff]  }
  0x1a   : >> { %1769 = vmatprep.subr.bf16.mxu0 %v2039_v1  ;;  %v1950_v34 = vld [vmem:[%s2443_s1 + $0x148] sm:$0xff]   ;;  %v1951_v35 = vld [vmem:[%s2443_s1 + $0x10] sm:$0xff]   ;;  %v1953_v37 = vld [vmem:[%s2443_s1 + $0x18] sm:$0xff]  }
  0x1b   : >> { %v256_v25 = vrot.slane %v254_v19, 1  ;;  %v687_v27 = vrot.slane %v685_v21, 1  ;;  %v1952_v36 = vld [vmem:[%s2443_s1 + $0x150] sm:$0xff]   ;;  %v1954_v38 = vld [vmem:[%s2443_s1 + $0x158] sm:$0xff]   ;;  %v1955_v39 = vld [vmem:[%s2443_s1 + $0x20] sm:$0xff]  }
  0x1c   : >> { %1690 = vmatpush3.bf16.msra.mxu1 %v1933_v5  ;;  %v1956_v40 = vld [vmem:[%s2443_s1 + $0x160] sm:$0xff]   ;;  %v1957_v41 = vld [vmem:[%s2443_s1 + $0x28] sm:$0xff]   ;;  %v1959_v45 = vld [vmem:[%s2443_s1 + $0x30] sm:$0xff]  }
  0x1d   : >> { %1770 = vmatpush3.bf16.msra.mxu0 %v1934_v6  ;;  %1691 = vmatprep.subr.bf16.mxu1 %v2039_v1  ;;  %v257_v29 = vor.u32 %v256_v25, %v252_v24  ;;  %v688_v31 = vor.u32 %v687_v27, %v683_v26  ;;  %v2222_v42 = vld [vmem:[%s2127_s14] sm:$0xe]  ;;  %v1958_v43 = vld [vmem:[%s2443_s1 + $0x168] sm:$0xff]   ;;  %v1960_v46 = vld [vmem:[%s2443_s1 + $0x170] sm:$0xff]  }
  0x1e   : >> { %1771 = vmatprep.subr.bf16.mxu0 %v2039_v1  ;;  %v1432_v44 = vcombine.low %v2222_v42, %v2141_v12  ;;  %v1494_v47 = vld [vmem:[%s2127_s14 + $0x8] sm:$0xe]  ;;  %v1961_v48 = vld [vmem:[%s2443_s1 + $0x38] sm:$0xff]   ;;  %v1963_v51 = vld [vmem:[%s2443_s1 + $0x80] sm:$0xff]  }
  0x1f   : >> { %v1511_v49 = vcombine.low %v1494_v47, %v2150_v16  ;;  %v1962_v50 = vld [vmem:[%s2443_s1 + $0x178] sm:$0xff]   ;;  %v1965_v53 = vld [vmem:[%s2443_s1 + $0x180] sm:$0xff]   ;;  %v1966_v54 = vld [vmem:[%s2443_s1 + $0x88] sm:$0xff]  }
  0x20   : >> { %1692 = vmatpush3.bf16.msra.mxu1 %v1935_v7  ;;  %v1967_v55 = vld [vmem:[%s2443_s1 + $0x188] sm:$0xff]   ;;  %v1968_v56 = vld [vmem:[%s2443_s1 + $0x90] sm:$0xff]   ;;  %v1970_v58 = vld [vmem:[%s2443_s1 + $0x98] sm:$0xff]   ;;  %v456_v5 = vrot.slane %v1432_v44, 1 }
  0x21   : >> { %1772 = vmatpush3.bf16.msra.mxu0 %v1936_v8  ;;  %1693 = vmatprep.subr.bf16.mxu1 %v2039_v1  ;;  %v800_v52 = vrot.slane %v1511_v49, 1  ;;  %v1969_v57 = vld [vmem:[%s2443_s1 + $0x190] sm:$0xff]   ;;  %v1971_v59 = vld [vmem:[%s2443_s1 + $0x198] sm:$0xff]   ;;  %v1972_v60 = vld [vmem:[%s2443_s1 + $0xa0] sm:$0xff]  }
  0x22   : >> { %1773 = vmatprep.subr.bf16.mxu0 %v2039_v1  ;;  %v1973_v61 = vld [vmem:[%s2443_s1 + $0x1a0] sm:$0xff]   ;;  %v1974_v62 = vld [vmem:[%s2443_s1 + $0xa8] sm:$0xff]   ;;  %v1976_v0 = vld [vmem:[%s2443_s1 + $0xb0] sm:$0xff]  }
  0x23   : >> { %v1975_v63 = vld [vmem:[%s2443_s1 + $0x1a8] sm:$0xff]   ;;  %v1977_v2 = vld [vmem:[%s2443_s1 + $0x1b0] sm:$0xff]   ;;  %v1978_v3 = vld [vmem:[%s2443_s1 + $0xb8] sm:$0xff]  }
  0x24   : >> { %1694 = vmatpush3.bf16.msra.mxu1 %v1937_v9  ;;  %v1979_v4 = vld [vmem:[%s2443_s1 + $0x1b8] sm:$0xff]   ;;  %v1981_v6 = vld [vmem:[%s2443_s1 + $0xc0] sm:$0xff]   ;;  %v1521_v7 = vld [vmem:[%s2127_s14 + $0x10] sm:$0xf] }
  0x25   : >> { %1774 = vmatpush3.bf16.msra.mxu0 %v1938_v10  ;;  %1695 = vmatprep.subr.bf16.mxu1 %v2039_v1  ;;  %v1982_v8 = vld [vmem:[%s2443_s1 + $0x1c0] sm:$0xff]   ;;  %v1983_v9 = vld [vmem:[%s2443_s1 + $0xc8] sm:$0xff]   ;;  %v1986_v12 = vld [vmem:[%s2443_s1 + $0x1d0] sm:$0xff]  }
  0x26   : >> { %1775 = vmatprep.subr.bf16.mxu0 %v2039_v1  ;;  %v1984_v10 = vld [vmem:[%s2443_s1 + $0x1c8] sm:$0xff]   ;;  %v1988_v14 = vld [vmem:[%s2443_s1 + $0x1d8] sm:$0xff]   ;;  %v1989_v15 = vld [vmem:[%s2443_s1 + $0xe0] sm:$0xff]  }
  0x27   : >> { %v1990_v16 = vld [vmem:[%s2443_s1 + $0x1e0] sm:$0xff]   ;;  %v1547_v18 = vld [vmem:[%s2127_s14 + $0x14] sm:$0x1]  ;;  %v1991_v19 = vld [vmem:[%s2443_s1 + $0xe8] sm:$0xff]  }
  0x28   : >> { %1696 = vmatpush3.bf16.msra.mxu1 %v1939_v13  ;;  %v1987_v13 = vld [vmem:[%s2443_s1 + $0xd8] sm:$0xff]   ;;  %v1992_v21 = vld [vmem:[%s2443_s1 + $0x1e8] sm:$0xff]   ;;  %v1994_v24 = vld [vmem:[%s2443_s1 + $0x1f0] sm:$0xff]  }
  0x29   : >> { %1776 = vmatpush3.bf16.msra.mxu0 %v1940_v17  ;;  %1697 = vmatprep.subr.bf16.mxu1 %v2039_v1  ;;  %v1546_v17 = vld [vmem:[%s2127_s14 + $0x10] sm:$0xf]  ;;  %v1995_v25 = vld [vmem:[%s2443_s1 + $0xf8] sm:$0xff]  }
  0x2a   : >> { %1777 = vmatprep.subr.bf16.mxu0 %v2039_v1 }
  0x2c   : >> { %1698 = vmatpush3.bf16.msra.mxu1 %v1941_v20  ;;  %v1564_v20 = vcombine.low %v1546_v17, %v1547_v18 }
  0x2d   : >> { %1778 = vmatpush3.bf16.msra.mxu0 %v1942_v22  ;;  %1699 = vmatprep.subr.bf16.mxu1 %v2039_v1  ;;  %v1993_v22 = vld [vmem:[%s2443_s1 + $0xf0] sm:$0xff]  }
  0x2e   : >> { %1779 = vmatprep.subr.bf16.mxu0 %v2039_v1  ;;  %v1027_v26 = vshrl.u32 %v1564_v20, 16 }
  0x30   : >> { %1700 = vmatpush3.bf16.msra.mxu1 %v1943_v23  ;;  %v1029_v23 = vshll.u32 %v1564_v20, 16 }
  0x31   : >> { %1780 = vmatpush3.bf16.msra.mxu0 %v1944_v28  ;;  %1705 = vmatprep.subr.bf16.mxu1 %v2039_v1  ;;  %v1996_v28 = vld [vmem:[%s2443_s1 + $0x1f8] sm:$0xff]  }
  0x32   : >> { %1785 = vmatprep.subr.bf16.mxu0 %v2039_v1  ;;  %v1031_v27 = vrot.slane %v1029_v23, 1 }
  0x33   : >> { %1702 = vmatmul.mubr.bf16.vlgmr.msra.gmra.mrb[0].mxu1 %v257_v29  ;;  %v1442_v29 = vld [vmem:[%s2127_s14 + $0x8] sm:$0xf] }
  0x34   : >> { %1706 = vmatpush3.bf16.msra.mxu1 %v1946_v30  ;;  %1782 = vmatmul.mubr.bf16.vlgmr.msra.gmra.mrb[0].mxu0 %v688_v31  ;;  %v1032_v30 = vor.u32 %v1031_v27, %v1027_v26  ;;  %v1998_v31 = vld [vmem:[%s2443_s1 + $0x200] sm:$0xff]  }
  0x35   : >> { %1786 = vmatpush3.bf16.msra.mxu0 %v1948_v32  ;;  %1707 = vmatprep.subr.bf16.mxu1 %v2039_v1  ;;  %v1999_v32 = vld [vmem:[%s2443_s1 + $0x208] sm:$0xff]  }
  0x36   : >> { %1787 = vmatprep.subr.bf16.mxu0 %v2039_v1  ;;  %1721 = vmatprep.mubr.msk.bf16.mxu1 %vm2040_vm0, %v2039_v1 }
  0x37   : >> { %1801 = vmatprep.mubr.msk.bf16.mxu0 %vm2040_vm0, %v2039_v1 }
  0x38   : >> { %1708 = vmatpush3.bf16.msra.mxu1 %v1949_v33  ;;  %v2000_v33 = vld [vmem:[%s2443_s1 + $0x210] sm:$0xff]  }
  0x39   : >> { %1788 = vmatpush3.bf16.msra.mxu0 %v1950_v34  ;;  %1709 = vmatprep.subr.bf16.mxu1 %v2039_v1  ;;  %v2001_v34 = vld [vmem:[%s2443_s1 + $0x218] sm:$0xff]  }
  0x3a   : >> { %1789 = vmatprep.subr.bf16.mxu0 %v2039_v1 }
  0x3c   : >> { %1710 = vmatpush3.bf16.msra.mxu1 %v1951_v35  ;;  %v2002_v35 = vld [vmem:[%s2443_s1 + $0x220] sm:$0xff]  }
  0x3d   : >> { %1790 = vmatpush3.bf16.msra.mxu0 %v1952_v36  ;;  %1711 = vmatprep.subr.bf16.mxu1 %v2039_v1  ;;  %v2003_v36 = vld [vmem:[%s2443_s1 + $0x228] sm:$0xff]  }
  0x3e   : >> { %1791 = vmatprep.subr.bf16.mxu0 %v2039_v1 }
  0x40   : >> { %1712 = vmatpush3.bf16.msra.mxu1 %v1953_v37  ;;  %v2004_v37 = vld [vmem:[%s2443_s1 + $0x230] sm:$0xff]  }
  0x41   : >> { %1792 = vmatpush3.bf16.msra.mxu0 %v1954_v38  ;;  %1713 = vmatprep.subr.bf16.mxu1 %v2039_v1  ;;  %v1573_v38 = vld [vmem:[%s2127_s14 + $0x10] sm:$0xe]  ;;  %s1599_s14 = sshll.u32 %s2037_s21, 2  ;;  %s206_s21 = sadd.s32 1, %s2037_s21  }
  0x42   : >> { %1793 = vmatprep.subr.bf16.mxu0 %v2039_v1  ;;  %s1240_s18 = scalar_lea.vmem %s2077_s17, %s1599_s14  ;;  %p203_p5 = scmp.ge.s32.totalorder %s206_s21, 8  }
  0x44   : >> { %1714 = vmatpush3.bf16.msra.mxu1 %v1955_v39  ;;  %v1590_v39 = vcombine.low %v1573_v38, %v1547_v18 }
  0x45   : >> { %1794 = vmatpush3.bf16.msra.mxu0 %v1956_v40  ;;  %1715 = vmatprep.subr.bf16.mxu1 %v2039_v1  ;;  %v2005_v40 = vld [vmem:[%s2443_s1 + $0x238] sm:$0xff]  }
  0x46   : >> { %1795 = vmatprep.subr.bf16.mxu0 %v2039_v1 }
  0x48   : >> { %1716 = vmatpush3.bf16.msra.mxu1 %v1957_v41  ;;  %v1144_v41 = vrot.slane %v1590_v39, 1 }
  0x49   : >> { %1796 = vmatpush3.bf16.msra.mxu0 %v1958_v43  ;;  %1717 = vmatprep.subr.bf16.mxu1 %v2039_v1 }
  0x4a   : >> { %1797 = vmatprep.subr.bf16.mxu0 %v2039_v1 }
  0x4c   : >> { %1718 = vmatpush3.bf16.msra.mxu1 %v1959_v45 }
  0x4d   : >> { %1798 = vmatpush3.bf16.msra.mxu0 %v1960_v46  ;;  %1719 = vmatprep.subr.bf16.mxu1 %v2039_v1 }
  0x4e   : >> { %1799 = vmatprep.subr.bf16.mxu0 %v2039_v1 }
  0x50   : >> { %1720 = vmatpush3.bf16.msra.mxu1 %v1961_v48 }
  0x51   : >> { %1800 = vmatpush3.bf16.msra.mxu0 %v1962_v50  ;;  %1725 = vmatprep.subr.bf16.mxu1 %v2039_v1 }
  0x52   : >> { %1805 = vmatprep.subr.bf16.mxu0 %v2039_v1 }
  0x53   : >> { %1722 = vmatmul.mubr.bf16.vlgmr.msra.gmra.mrb[0].mxu1 %v2138_v11  ;;  %v1985_v11 = vld [vmem:[%s2443_s1 + $0xd0] sm:$0xff]  }
  0x54   : >> { %1726 = vmatpush3.bf16.msra.mxu1 %v1963_v51  ;;  %1802 = vmatmul.mubr.bf16.vlgmr.msra.gmra.mrb[0].mxu0 %v800_v52 }
  0x55   : >> { %1806 = vmatpush3.bf16.msra.mxu0 %v1965_v53  ;;  %1727 = vmatprep.subr.bf16.mxu1 %v2039_v1 }
  0x56   : >> { %1807 = vmatprep.subr.bf16.mxu0 %v2039_v1  ;;  %1741 = vmatprep.mubr.msk.bf16.mxu1 %vm2040_vm0, %v2039_v1 }
  0x57   : >> { %1821 = vmatprep.mubr.msk.bf16.mxu0 %vm2040_vm0, %v2039_v1 }
  0x58   : >> { %1728 = vmatpush3.bf16.msra.mxu1 %v1966_v54 }
  0x59   : >> { %1808 = vmatpush3.bf16.msra.mxu0 %v1967_v55  ;;  %1729 = vmatprep.subr.bf16.mxu1 %v2039_v1 }
  0x5a   : >> { %1809 = vmatprep.subr.bf16.mxu0 %v2039_v1 }
  0x5c   : >> { %1730 = vmatpush3.bf16.msra.mxu1 %v1968_v56 }
  0x5d   : >> { %1810 = vmatpush3.bf16.msra.mxu0 %v1969_v57  ;;  %1731 = vmatprep.subr.bf16.mxu1 %v2039_v1 }
  0x5e   : >> { %1811 = vmatprep.subr.bf16.mxu0 %v2039_v1 }
  0x60   : >> { %1732 = vmatpush3.bf16.msra.mxu1 %v1970_v58 }
  0x61   : >> { %1812 = vmatpush3.bf16.msra.mxu0 %v1971_v59  ;;  %1733 = vmatprep.subr.bf16.mxu1 %v2039_v1 }
  0x62   : >> { %1813 = vmatprep.subr.bf16.mxu0 %v2039_v1 }
  0x64   : >> { %1734 = vmatpush3.bf16.msra.mxu1 %v1972_v60 }
  0x65   : >> { %1814 = vmatpush3.bf16.msra.mxu0 %v1973_v61  ;;  %1735 = vmatprep.subr.bf16.mxu1 %v2039_v1 }
  0x66   : >> { %1815 = vmatprep.subr.bf16.mxu0 %v2039_v1 }
  0x68   : >> { %1736 = vmatpush3.bf16.msra.mxu1 %v1974_v62 }
  0x69   : >> { %1816 = vmatpush3.bf16.msra.mxu0 %v1975_v63  ;;  %1737 = vmatprep.subr.bf16.mxu1 %v2039_v1 }
  0x6a   : >> { %1817 = vmatprep.subr.bf16.mxu0 %v2039_v1 }
  0x6c   : >> { %1738 = vmatpush3.bf16.msra.mxu1 %v1976_v0 }
  0x6d   : >> { %1818 = vmatpush3.bf16.msra.mxu0 %v1977_v2  ;;  %1739 = vmatprep.subr.bf16.mxu1 %v2039_v1 }
  0x6e   : >> { %1819 = vmatprep.subr.bf16.mxu0 %v2039_v1 }
  0x70   : >> { %1740 = vmatpush3.bf16.msra.mxu1 %v1978_v3 }
  0x71   : >> { %1820 = vmatpush3.bf16.msra.mxu0 %v1979_v4  ;;  %1745 = vmatprep.subr.bf16.mxu1 %v2039_v1 }
  0x72   : >> { %1825 = vmatprep.subr.bf16.mxu0 %v2039_v1 }
  0x73   : >> { %1742 = vmatmul.mubr.bf16.vlgmr.msra.gmra.mrb[0].mxu1 %v456_v5 }
  0x74   : >> { %1746 = vmatpush3.bf16.msra.mxu1 %v1981_v6  ;;  %1822 = vmatmul.mubr.bf16.vlgmr.msra.gmra.mrb[0].mxu0 %v1521_v7 }
  0x75   : >> { %1826 = vmatpush3.bf16.msra.mxu0 %v1982_v8  ;;  %1747 = vmatprep.subr.bf16.mxu1 %v2039_v1 }
  0x76   : >> { %1827 = vmatprep.subr.bf16.mxu0 %v2039_v1  ;;  %1761 = vmatprep.mubr.msk.bf16.mxu1 %vm2040_vm0, %v2039_v1 }
  0x77   : >> { %1841 = vmatprep.mubr.msk.bf16.mxu0 %vm2040_vm0, %v2039_v1 }
  0x78   : >> { %1748 = vmatpush3.bf16.msra.mxu1 %v1983_v9 }
  0x79   : >> { %1828 = vmatpush3.bf16.msra.mxu0 %v1984_v10  ;;  %1749 = vmatprep.subr.bf16.mxu1 %v2039_v1 }
  0x7a   : >> { %1829 = vmatprep.subr.bf16.mxu0 %v2039_v1 }
  0x7c   : >> { %1750 = vmatpush3.bf16.msra.mxu1 %v1985_v11 }
  0x7d   : >> { %1830 = vmatpush3.bf16.msra.mxu0 %v1986_v12  ;;  %1751 = vmatprep.subr.bf16.mxu1 %v2039_v1 }
  0x7e   : >> { %1831 = vmatprep.subr.bf16.mxu0 %v2039_v1 }
  0x80   : >> { %1752 = vmatpush3.bf16.msra.mxu1 %v1987_v13 }
  0x81   : >> { %1832 = vmatpush3.bf16.msra.mxu0 %v1988_v14  ;;  %1753 = vmatprep.subr.bf16.mxu1 %v2039_v1 }
  0x82   : >> { %1833 = vmatprep.subr.bf16.mxu0 %v2039_v1 }
  0x84   : >> { %1754 = vmatpush3.bf16.msra.mxu1 %v1989_v15 }
  0x85   : >> { %1834 = vmatpush3.bf16.msra.mxu0 %v1990_v16  ;;  %1755 = vmatprep.subr.bf16.mxu1 %v2039_v1 }
  0x86   : >> { %1835 = vmatprep.subr.bf16.mxu0 %v2039_v1 }
  0x88   : >> { %1756 = vmatpush3.bf16.msra.mxu1 %v1991_v19 }
  0x89   : >> { %1836 = vmatpush3.bf16.msra.mxu0 %v1992_v21  ;;  %1757 = vmatprep.subr.bf16.mxu1 %v2039_v1 }
  0x8a   : >> { %1837 = vmatprep.subr.bf16.mxu0 %v2039_v1 }
  0x8c   : >> { %1758 = vmatpush3.bf16.msra.mxu1 %v1993_v22 }
  0x8d   : >> { %1838 = vmatpush3.bf16.msra.mxu0 %v1994_v24  ;;  %1759 = vmatprep.subr.bf16.mxu1 %v2039_v1 }
  0x8e   : >> { %1839 = vmatprep.subr.bf16.mxu0 %v2039_v1 }
  0x90   : >> { %1760 = vmatpush3.bf16.msra.mxu1 %v1995_v25 }
  0x91   : >> { %1840 = vmatpush3.bf16.msra.mxu0 %v1996_v28 }
  0x92   : >> { %1845 = vmatprep.subr.bf16.mxu0 %v2039_v1 }
  0x93   : >> { %1762 = vmatmul.mubr.bf16.vlgmr.msra.gmra.mrb[0].mxu1 %v1442_v29 }
  0x94   : >> { %1842 = vmatmul.mubr.bf16.vlgmr.msra.gmra.mrb[0].mxu0 %v1032_v30 }
  0x95   : >> { %1846 = vmatpush3.bf16.msra.mxu0 %v1998_v31  ;;  %1861 = vmatprep.mubr.msk.bf16.mxu0 %vm2040_vm0, %v2039_v1 }
  0x96   : >> { %1847 = vmatprep.subr.bf16.mxu0 %v2039_v1 }
  0x99   : >> { %1848 = vmatpush3.bf16.msra.mxu0 %v1999_v32 }
  0x9a   : >> { %1849 = vmatprep.subr.bf16.mxu0 %v2039_v1 }
  0x9d   : >> { %1850 = vmatpush3.bf16.msra.mxu0 %v2000_v33 }
  0x9e   : >> { %1851 = vmatprep.subr.bf16.mxu0 %v2039_v1 }
  0xa1   : >> { %1852 = vmatpush3.bf16.msra.mxu0 %v2001_v34 }
  0xa2   : >> { %1853 = vmatprep.subr.bf16.mxu0 %v2039_v1 }
  0xa5   : >> { %1854 = vmatpush3.bf16.msra.mxu0 %v2002_v35 }
  0xa6   : >> { %1855 = vmatprep.subr.bf16.mxu0 %v2039_v1 }
  0xa9   : >> { %1856 = vmatpush3.bf16.msra.mxu0 %v2003_v36 }
  0xaa   : >> { %1857 = vmatprep.subr.bf16.mxu0 %v2039_v1 }
  0xad   : >> { %1858 = vmatpush3.bf16.msra.mxu0 %v2004_v37 }
  0xae   : >> { %1859 = vmatprep.subr.bf16.mxu0 %v2039_v1 }
  0xb1   : >> { %1860 = vmatpush3.bf16.msra.mxu0 %v2005_v40 }
  0xb4   : >> { %1862 = vmatmul.mubr.bf16.vlgmr.msra.gmra.mrb[0].mxu0 %v1144_v41 }
 0x166   : >> { %v651_v42 = vpop.f32.mrb[0].mxu1 }
 0x167   : >> { %v1763_v43 = vpop.f32.mrb[1].mxu1 }
 0x168   : >> { %v654_v44 = vpop.f32.mrb[2].mxu1 }
 0x169   : >> { %v1764_v45 = vpop.f32.mrb[3].mxu1 }
 0x187   : >> { %v1228_v46 = vpop.f32.mrb[0].mxu0 }
 0x188   : >> { %v1865_v47 = vadd.f32 %v1228_v46, %v651_v42  ;;  %v1863_v48 = vpop.f32.mrb[1].mxu0 }
 0x189   : >> { %v1231_v49 = vpop.f32.mrb[2].mxu0  ;;  %205 = sbr.rel (!%p203_p5) target bundleno = 18 (0x12), region = 80 }
 0x18a   : >> { %vm1235_vm1 = vcmp.ge.f32.partialorder %v1865_v47, 0.0  ;;  %v1236_v50 = vmul.f32 0.2, %v1865_v47  ;;  %v1864_v51 = vpop.f32.mrb[3].mxu0 }
 0x18c   : >> { %v1237_v52 = vsel %vm1235_vm1, %v1865_v47, %v1236_v50 }
 0x18d   : >> { %v1238_v53 = vpack.c.bf16 %v1237_v52, %v1237_v52 }
 0x18f   : >> { %1241 = vst [vmem:[%s1240_s18] sm:$0xf] %v1238_v53 }
 0x190 PF: > { %s12_s11 = sadd.s32 1, %s2033_s11   ;;  %s2445_s9 = smov %s2029_s10 }
 0x191   : > { %p9_p6 = scmp.ge.s32.totalorder %s12_s11, 4   ;;  %s2446_s10 = smov %s2448_s12 }
 0x193   :  { %11 = sbr.rel (!%p9_p6) target bundleno = 2 (0x2), region = 91 }

// kernel: _lambda_.7
= control target key start
LH: loop header
LB: loop body
LE: loop exit
PB: predicated region body
PF: predicated region fallthrough
CT: control target
= control target key end

     0   :  { %v52_v0 = vlaneseq  ;;  %s387_s0 = inlined_call_operand.vmem [shape: bf16[8,2048], index: 0, kind: input, shape index: {}]   ;;  %s388_s1 = inlined_call_operand.vmem [shape: bf16[1,2048], index: 1, kind: input, shape index: {}]   ;;  %s389_s2 = inlined_call_operand.hbm [shape: f32[1,1], index: 2, kind: output, shape index: {}]  }
   0x1   :  { %v42_v1 = vld [vmem:[%s388_s1] sm:$0xff] }
   0x2   :  { %7 = vsyncpa [#allocation4], 0  ;;  %v44_v2 = vunpack.c.l.bf16 %v42_v1  ;;  %v53_v3 = vshrl.u32 %v52_v0, 7  ;;  %v18_v7 = vld [vmem:[%s387_s0] sm:$0xff]  ;;  %v45_v11 = vunpack.c.h.bf16 %v42_v1  ;;  %v19_v13 = vld [vmem:[%s387_s0 + $0x8] sm:$0xff]  ;;  %vm16_vm0 = vcmask 0  }
   0x3   :  { %v26_v14 = vunpack.c.l.bf16 %v18_v7  ;;  %v27_v15 = vunpack.c.h.bf16 %v18_v7  ;;  %v20_v19 = vld [vmem:[%s387_s0 + $0x10] sm:$0xff]  ;;  %v28_v20 = vunpack.c.l.bf16 %v19_v13  ;;  %v29_v23 = vunpack.c.h.bf16 %v19_v13  ;;  %v43_v24 = vld [vmem:[%s388_s1 + $0x8] sm:$0xff]  ;;  %v21_v30 = vld [vmem:[%s387_s0 + $0x18] sm:$0xff] }
   0x4   :  { %v305_v4 = vsub.s32 0, %v53_v3  ;;  %v307_v5 = vsub.s32 2, %v53_v3  ;;  %v309_v6 = vsub.s32 4, %v53_v3  ;;  %v316_v10 = vsub.s32 6, %v53_v3  ;;  %v22_v41 = vld [vmem:[%s387_s0 + $0x20] sm:$0xff]  ;;  %v23_v53 = vld [vmem:[%s387_s0 + $0x28] sm:$0xff] }
   0x5   :  { %v30_v29 = vunpack.c.l.bf16 %v20_v19  ;;  %v46_v31 = vunpack.c.l.bf16 %v43_v24  ;;  %v31_v35 = vunpack.c.h.bf16 %v20_v19  ;;  %v32_v40 = vunpack.c.l.bf16 %v21_v30  ;;  %v24_v0 = vld [vmem:[%s387_s0 + $0x30] sm:$0xff]  ;;  %v25_v19 = vld [vmem:[%s387_s0 + $0x38] sm:$0xff]  ;;  %s286_s0 = smov [#allocation3]  }
   0x6   :  { %v55_v8 = vrot.slane %v44_v2, %v305_v4  ;;  %v59_v9 = vrot.slane %v44_v2, %v307_v5  ;;  %v63_v12 = vrot.slane %v44_v2, %v309_v6  ;;  %v67_v16 = vrot.slane %v44_v2, %v316_v10  ;;  %s251_s28 = sshll.u32 %s286_s0, 4  ;;  %s252_s28 = int_to_ptr.vmem [resolvable:$true] %s251_s28 }
   0x7   :  { %v71_v21 = vrot.slane %v45_v11, %v305_v4  ;;  %v75_v25 = vrot.slane %v45_v11, %v307_v5  ;;  %v79_v32 = vrot.slane %v45_v11, %v309_v6  ;;  %v83_v36 = vrot.slane %v45_v11, %v316_v10  ;;  %s261_s29 = scalar_lea.vmem %s252_s28, 16  ;;  %s265_s30 = scalar_lea.vmem %s252_s28, 32 }
   0x8   :  { %v135_v17 = vrot.slane %v55_v8, %v305_v4  ;;  %v139_v18 = vrot.slane %v59_v9, %v305_v4  ;;  %v143_v22 = vrot.slane %v63_v12, %v305_v4  ;;  %v147_v26 = vrot.slane %v67_v16, %v305_v4  ;;  %p262_p0 = scmp.ne.s32.totalorder %s252_s28, %s261_s29  ;;  %p266_p1 = scmp.lt.s32.totalorder %s252_s28, %s252_s28 }
   0x9   :  { %v151_v33 = vrot.slane %v71_v21, %v305_v4  ;;  %v155_v37 = vrot.slane %v75_v25, %v305_v4  ;;  %v87_v42 = vrot.slane %v46_v31, %v305_v4  ;;  %v159_v43 = vrot.slane %v79_v32, %v305_v4  ;;  %p267_p2 = scmp.lt.s32.totalorder %s265_s30, %s261_s29 }
   0xa   :  { %v196_v27 = vmul.f32 %v135_v17, %v26_v14  ;;  %v197_v28 = vmul.f32 %v139_v18, %v27_v15  ;;  %v198_v34 = vmul.f32 %v143_v22, %v28_v20  ;;  %v199_v38 = vmul.f32 %v147_v26, %v29_v23 }
   0xb   :  { %v200_v44 = vmul.f32 %v151_v33, %v30_v29  ;;  %v33_v46 = vunpack.c.h.bf16 %v21_v30  ;;  %v91_v47 = vrot.slane %v46_v31, %v307_v5  ;;  %v163_v48 = vrot.slane %v83_v36, %v305_v4  ;;  %p268_p3 = por %p267_p2, %p266_p1 }
   0xc   :  { %v212_v39 = vadd.f32 %v197_v28, %v196_v27  ;;  %v201_v49 = vmul.f32 %v155_v37, %v31_v35  ;;  %v34_v51 = vunpack.c.l.bf16 %v22_v41  ;;  %v47_v52 = vunpack.c.h.bf16 %v43_v24 }
   0xd   :  { %v95_v54 = vrot.slane %v46_v31, %v309_v6  ;;  %v167_v55 = vrot.slane %v87_v42, %v305_v4  ;;  %v202_v56 = vmul.f32 %v159_v43, %v32_v40  ;;  %v35_v58 = vunpack.c.h.bf16 %v22_v41  ;;  %p269_p4 = pnand %p268_p3, %p262_p0 }
   0xe   :  { %v213_v45 = vadd.f32 %v212_v39, %v198_v34  ;;  %v99_v59 = vrot.slane %v46_v31, %v316_v10  ;;  %v171_v60 = vrot.slane %v91_v47, %v305_v4  ;;  %v203_v61 = vmul.f32 %v163_v48, %v33_v46 }
   0xf   :  { %v36_v63 = vunpack.c.l.bf16 %v23_v53  ;;  %v103_v1 = vrot.slane %v47_v52, %v305_v4  ;;  %v175_v2 = vrot.slane %v95_v54, %v305_v4  ;;  %v204_v3 = vmul.f32 %v167_v55, %v34_v51 }
  0x10   :  { %v214_v50 = vadd.f32 %v213_v45, %v199_v38  ;;  %v37_v8 = vunpack.c.h.bf16 %v23_v53  ;;  %v107_v9 = vrot.slane %v47_v52, %v307_v5  ;;  %v179_v11 = vrot.slane %v99_v59, %v305_v4 }
  0x11   :  { %v205_v12 = vmul.f32 %v171_v60, %v35_v58  ;;  %v38_v14 = vunpack.c.l.bf16 %v24_v0  ;;  %v111_v15 = vrot.slane %v47_v52, %v309_v6  ;;  %v183_v16 = vrot.slane %v103_v1, %v305_v4 }
  0x12   :  { %v215_v57 = vadd.f32 %v214_v50, %v200_v44  ;;  %v206_v17 = vmul.f32 %v175_v2, %v36_v63  ;;  %v39_v20 = vunpack.c.h.bf16 %v24_v0  ;;  %v115_v21 = vrot.slane %v47_v52, %v316_v10 }
  0x13   :  { %v187_v5 = vrot.slane %v107_v9, %v305_v4  ;;  %v207_v22 = vmul.f32 %v179_v11, %v37_v8  ;;  %v40_v24 = vunpack.c.l.bf16 %v25_v19  ;;  %v191_v25 = vrot.slane %v111_v15, %v305_v4 }
  0x14   :  { %v216_v62 = vadd.f32 %v215_v57, %v201_v49  ;;  %v208_v26 = vmul.f32 %v183_v16, %v38_v14  ;;  %v41_v27 = vunpack.c.h.bf16 %v25_v19  ;;  %v195_v28 = vrot.slane %v115_v21, %v305_v4 }
  0x15   :  { %v209_v29 = vmul.f32 %v187_v5, %v39_v20  ;;  %v210_v31 = vmul.f32 %v191_v25, %v40_v24  ;;  %v285_v36 = vmov 0.0  }
  0x16   :  { %v217_v7 = vadd.f32 %v216_v62, %v202_v56  ;;  %v211_v33 = vmul.f32 %v195_v28, %v41_v27  ;;  %17 = vst.msk [vmem:[#allocation2] sm:$0x1] %vm16_vm0, %v285_v36 }
  0x18   :  { %v218_v13 = vadd.f32 %v217_v7, %v203_v61 }
  0x1a   :  { %v219_v18 = vadd.f32 %v218_v13, %v204_v3 }
  0x1c   :  { %v220_v23 = vadd.f32 %v219_v18, %v205_v12 }
  0x1d   :  { %v229_v4 = vld [vmem:[#allocation2] sm:$0x1] }
  0x1e   :  { %v221_v6 = vadd.f32 %v220_v23, %v206_v17 }
  0x20   :  { %v222_v30 = vadd.f32 %v221_v6, %v207_v22 }
  0x22   :  { %v223_v32 = vadd.f32 %v222_v30, %v208_v26 }
  0x24   :  { %v224_v34 = vadd.f32 %v223_v32, %v209_v29 }
  0x26   :  { %v225_v35 = vadd.f32 %v224_v34, %v210_v31 }
  0x28   :  { %v226_v10 = vadd.f32 %v225_v35, %v211_v33 }
  0x2a   :  { %227 = vadd.xlane.f32.xlu0 %v226_v10 }
  0xb7   :  { %v228_v37 = vpop.xlane.xlu0 %227 }
  0xb8   :  { %v230_v38 = vrot.slane %v228_v37, 4 }
  0xba   :  { %v231_v39 = vadd.f32 %v230_v38, %v228_v37 }
  0xbc   :  { %v232_v40 = vrot.slane %v231_v39, 2 }
  0xbe   :  { %v233_v41 = vadd.f32 %v232_v40, %v231_v39 }
  0xc0   :  { %v234_v42 = vrot.slane %v233_v41, 1 }
  0xc2   :  { %v235_v43 = vadd.f32 %v234_v42, %v233_v41 }
  0xc4   :  { %v236_v44 = vadd.f32 %v235_v43, %v229_v4 }
  0xc6   :  { %238 = vst.msk [vmem:[#allocation2] sm:$0x1] %vm16_vm0, %v236_v44 }
  0xcd   :  { %v242_v45 = vld [vmem:[#allocation2] sm:$0x1] }
  0xce   :  { %v243_v46 = vmul.f32 0.5, %v242_v45 }
  0xd0   :  { %244 = vst.msk [vmem:[#allocation3] sm:$0x1] %vm16_vm0, %v243_v46 }
  0xd1   :  { %272 = shalt.err (!%p269_p4)
}
  0xd2   :  { %s273_s5 = scalar_lea.hbm %s389_s2, 16 }
  0xd3   :  { %p274_p5 = scmp.ne.s32.totalorder %s389_s2, %s273_s5  ;;  %p277_p6 = scmp.lt.u32.totalorder %s273_s5, %s389_s2 }
  0xd5   :  { %p279_p7 = pnand %p277_p6, %p274_p5 }
  0xd7   :  { %282 = shalt.err (!%p279_p7)
}
  0xd8   :  { %254 = dma.vmem_to_hbm [thread:$0]  %s252_s28, 16, %s389_s2, [#allocation4]  }
  0xd9   :  { %283 = dma.done.wait [#allocation4], 16  }
  0xda   :  { %284 = vsyncadd [#allocation4], 4294967280 }
  0xdb   :  { %258 = vsyncpa [#allocation4], 1 }

// kernel: _lambda_.6
= control target key start
LH: loop header
LB: loop body
LE: loop exit
PB: predicated region body
PF: predicated region fallthrough
CT: control target
= control target key end

     0   :  { %s2573_s9 = smov 0   ;;  %s2575_s10 = smov 0   ;;  %s3016_s0 = inlined_call_operand.vmem [shape: bf16[2,5,5,512], index: 0, kind: input, shape index: {}]   ;;  %s3017_s1 = inlined_call_operand.vmem [shape: bf16[2,2,512,128], index: 1, kind: input, shape index: {}]   ;;  %s3018_s2 = inlined_call_operand.vmem [shape: bf16[2,4,4,128], index: 2, kind: output, shape index: {}]  }
   0x1   :  { %s2577_s11 = smov 0  }
   0x2 LB: > { %s27_s12 = sadd.s32 1, %s2548_s10  ;;  %p1821_p0 = scmp.ge.s32.totalorder %s2552_s11, 1  ;;  %s2552_s11 = sphi %s2577_s11, %s12_s11   ;;  %s2548_s10 = sphi %s2575_s10, %s3020_s10   ;;  %s2544_s9 = sphi %s2573_s9, %s3019_s9  }
   0x3   : > { %p29_p1 = scmp.ge.s32.totalorder %s27_s12, 2  ;;  %p144_p2 = scmp.lt.s32.totalorder %s2552_s11, 3 }
   0x5   : > { %s3022_s12 = smov (%p29_p1, %s27_s12), 0  ;;  %p145_p3 = pnand %p1821_p0, %p144_p2 }
   0x6   : > { %p177_p4 = scmp.lt.s32.totalorder (!%p145_p3), %s2544_s9, 1  ;;  %s2601_s21 = smov (!%p145_p3), 0  }
   0x7   : > { %148 = sbr.rel (%p145_p3) target bundleno = 374 (0x176), region = 28 }
   0xe   : > { %s3024_s9 = smov (!%p177_p4, %s2544_s9), 1 }
   0xf   : > { %s2349_s13 = smul.u32 80, %s3024_s9  ;;  %s2171_s14 = sshll.u32 %s3024_s9, 3 }
  0x10   : > { %s2594_s17 = scalar_lea.vmem %s3018_s2, %s2171_s14 }
  0x11   : > { %s2599_s20 = scalar_lea.vmem %s3016_s0, %s2349_s13 }
  0x12 LB: >> { %v2382_v0 = vld [vmem:[%s3017_s1 + $0x140] sm:$0xff]   ;;  %v2386_v4 = vld [vmem:[%s3017_s1 + $0x148] sm:$0xff]   ;;  %v2390_v8 = vld [vmem:[%s3017_s1 + $0x150] sm:$0xff]   ;;  %s2172_s4 = sshll.u32 %s2556_s21, 4  ;;  %s2556_s21 = sphi %s2601_s21, %s206_s21  }
  0x13   : >> { %v2383_v1 = vld [vmem:[%s3017_s1 + $0x1c0] sm:$0xff]   ;;  %2173 = vmatprep.subr.bf16.mxu0 %v2382_v0  ;;  %v2387_v5 = vld [vmem:[%s3017_s1 + $0x1c8] sm:$0xff]   ;;  %v2391_v9 = vld [vmem:[%s3017_s1 + $0x1d0] sm:$0xff]   ;;  %s2698_s14 = scalar_lea.vmem %s2599_s20, %s2172_s4 }
  0x14   : >> { %v2384_v2 = vld [vmem:[%s3017_s1 + $0x100] sm:$0xff]   ;;  %2195 = vmatprep.subr.bf16.mxu1 %v2383_v1  ;;  %v2388_v6 = vld [vmem:[%s3017_s1 + $0x108] sm:$0xff]   ;;  %v2392_v10 = vld [vmem:[%s3017_s1 + $0x110] sm:$0xff]  }
  0x15   : >> { %v2385_v3 = vld [vmem:[%s3017_s1 + $0x180] sm:$0xff]   ;;  %2174 = vmatpush3.bf16.msra.mxu0 %v2384_v2  ;;  %v2389_v7 = vld [vmem:[%s3017_s1 + $0x188] sm:$0xff]   ;;  %v2393_v11 = vld [vmem:[%s3017_s1 + $0x190] sm:$0xff]  }
  0x16   : >> { %2196 = vmatpush3.bf16.msra.mxu1 %v2385_v3  ;;  %2175 = vmatprep.subr.bf16.mxu0 %v2386_v4  ;;  %v2394_v12 = vld [vmem:[%s3017_s1 + $0x158] sm:$0xff]   ;;  %v2398_v16 = vld [vmem:[%s3017_s1 + $0x160] sm:$0xff]   ;;  %v2402_v20 = vld [vmem:[%s3017_s1 + $0x168] sm:$0xff]  }
  0x17   : >> { %2197 = vmatprep.subr.bf16.mxu1 %v2387_v5  ;;  %v2395_v13 = vld [vmem:[%s3017_s1 + $0x1d8] sm:$0xff]   ;;  %v2399_v17 = vld [vmem:[%s3017_s1 + $0x1e0] sm:$0xff]   ;;  %v2403_v21 = vld [vmem:[%s3017_s1 + $0x1e8] sm:$0xff]  }
  0x18   : >> { %v2396_v14 = vld [vmem:[%s3017_s1 + $0x118] sm:$0xff]   ;;  %v2400_v18 = vld [vmem:[%s3017_s1 + $0x120] sm:$0xff]   ;;  %v2404_v22 = vld [vmem:[%s3017_s1 + $0x128] sm:$0xff]  }
  0x19   : >> { %2176 = vmatpush3.bf16.msra.mxu0 %v2388_v6  ;;  %v2397_v15 = vld [vmem:[%s3017_s1 + $0x198] sm:$0xff]   ;;  %v2401_v19 = vld [vmem:[%s3017_s1 + $0x1a0] sm:$0xff]   ;;  %v2405_v23 = vld [vmem:[%s3017_s1 + $0x1a8] sm:$0xff]  }
  0x1a   : >> { %2198 = vmatpush3.bf16.msra.mxu1 %v2389_v7  ;;  %2177 = vmatprep.subr.bf16.mxu0 %v2390_v8  ;;  %v2406_v24 = vld [vmem:[%s3017_s1 + $0x170] sm:$0xff]   ;;  %v2410_v28 = vld [vmem:[%s3017_s1 + $0x178] sm:$0xff]   ;;  %v277_v32 = vld [vmem:[%s2698_s14] sm:$0x77] }
  0x1b   : >> { %2199 = vmatprep.subr.bf16.mxu1 %v2391_v9  ;;  %v2407_v25 = vld [vmem:[%s3017_s1 + $0x1f0] sm:$0xff]   ;;  %v2411_v29 = vld [vmem:[%s3017_s1 + $0x1f8] sm:$0xff]   ;;  %v278_v33 = vld [vmem:[%s2698_s14 + $0x8] sm:$0x77]  ;;  %v1891_v34 = vcombine.low %v277_v32, %v277_v32  ;;  %v1892_v35 = vcombine.high %v277_v32, %v277_v32 }
  0x1c   : >> { %v2408_v26 = vld [vmem:[%s3017_s1 + $0x130] sm:$0xff]   ;;  %v2412_v30 = vld [vmem:[%s3017_s1 + $0x138] sm:$0xff]   ;;  %v1893_v36 = vcombine.low %v278_v33, %v278_v33  ;;  %v1894_v37 = vcombine.high %v278_v33, %v278_v33  ;;  %v2418_v38 = vld [vmem:[%s3017_s1 + $0x40] sm:$0xff]  }
  0x1d   : >> { %2178 = vmatpush3.bf16.msra.mxu0 %v2392_v10  ;;  %v2409_v27 = vld [vmem:[%s3017_s1 + $0x1b0] sm:$0xff]   ;;  %v2413_v31 = vld [vmem:[%s3017_s1 + $0x1b8] sm:$0xff]   ;;  %v2419_v39 = vld [vmem:[%s3017_s1 + $0xc0] sm:$0xff]   ;;  %v362_v40 = vshrl.u32 %v1892_v35, 16  ;;  %v364_v41 = vshll.u32 %v1892_v35, 16  ;;  %v355_v44 = vshrl.u32 %v1891_v34, 16 }
  0x1e   : >> { %2200 = vmatpush3.bf16.msra.mxu1 %v2393_v11  ;;  %2179 = vmatprep.subr.bf16.mxu0 %v2394_v12  ;;  %v376_v42 = vshrl.u32 %v1894_v37, 16  ;;  %v378_v43 = vshll.u32 %v1894_v37, 16  ;;  %v357_v45 = vshll.u32 %v1891_v34, 16  ;;  %v369_v46 = vshrl.u32 %v1893_v36, 16  ;;  %v2420_v50 = vld [vmem:[%s3017_s1] sm:$0xff]   ;;  %v2422_v56 = vld [vmem:[%s3017_s1 + $0x48] sm:$0xff]  }
  0x1f   : >> { %2201 = vmatprep.subr.bf16.mxu1 %v2395_v13  ;;  %v371_v47 = vshll.u32 %v1893_v36, 16  ;;  %v366_v48 = vrot.slane %v364_v41, 1  ;;  %v2421_v51 = vld [vmem:[%s3017_s1 + $0x80] sm:$0xff]   ;;  %v2423_v59 = vld [vmem:[%s3017_s1 + $0xc8] sm:$0xff]   ;;  %v2426_v62 = vld [vmem:[%s3017_s1 + $0x50] sm:$0xff]  }
  0x20   : >> { %v380_v49 = vrot.slane %v378_v43, 1  ;;  %v359_v52 = vrot.slane %v357_v45, 1  ;;  %v2424_v60 = vld [vmem:[%s3017_s1 + $0x8] sm:$0xff]   ;;  %v2427_v63 = vld [vmem:[%s3017_s1 + $0xd0] sm:$0xff]   ;;  %v2430_v2 = vld [vmem:[%s3017_s1 + $0x58] sm:$0xff]  }
  0x21   : >> { %2180 = vmatpush3.bf16.msra.mxu0 %v2396_v14  ;;  %v373_v53 = vrot.slane %v371_v47, 1  ;;  %v367_v54 = vor.u32 %v366_v48, %v362_v40  ;;  %v2425_v61 = vld [vmem:[%s3017_s1 + $0x88] sm:$0xff]   ;;  %v2428_v0 = vld [vmem:[%s3017_s1 + $0x10] sm:$0xff]   ;;  %v2431_v3 = vld [vmem:[%s3017_s1 + $0xd8] sm:$0xff]  }
  0x22   : >> { %2202 = vmatpush3.bf16.msra.mxu1 %v2397_v15  ;;  %2181 = vmatprep.subr.bf16.mxu0 %v2398_v16  ;;  %v381_v55 = vor.u32 %v380_v49, %v376_v42  ;;  %v360_v57 = vor.u32 %v359_v52, %v355_v44  ;;  %v2429_v1 = vld [vmem:[%s3017_s1 + $0x90] sm:$0xff]   ;;  %v2432_v4 = vld [vmem:[%s3017_s1 + $0x18] sm:$0xff]   ;;  %v2434_v6 = vld [vmem:[%s3017_s1 + $0x60] sm:$0xff]  }
  0x23   : >> { %2203 = vmatprep.subr.bf16.mxu1 %v2399_v17  ;;  %v374_v58 = vor.u32 %v373_v53, %v369_v46  ;;  %610 = vmatprep.mubr.bf16.mxu0 %v367_v54  ;;  %v2433_v5 = vld [vmem:[%s3017_s1 + $0x98] sm:$0xff]   ;;  %v2435_v7 = vld [vmem:[%s3017_s1 + $0xe0] sm:$0xff]   ;;  %v2438_v10 = vld [vmem:[%s3017_s1 + $0x68] sm:$0xff]  }
  0x24   : >> { %650 = vmatprep.mubr.bf16.mxu1 %v381_v55  ;;  %v2436_v8 = vld [vmem:[%s3017_s1 + $0x20] sm:$0xff]   ;;  %v2439_v11 = vld [vmem:[%s3017_s1 + $0xe8] sm:$0xff]   ;;  %v2442_v14 = vld [vmem:[%s3017_s1 + $0x70] sm:$0xff]  }
  0x25   : >> { %2182 = vmatpush3.bf16.msra.mxu0 %v2400_v18  ;;  %v2437_v9 = vld [vmem:[%s3017_s1 + $0xa0] sm:$0xff]   ;;  %v2440_v12 = vld [vmem:[%s3017_s1 + $0x28] sm:$0xff]   ;;  %v2443_v15 = vld [vmem:[%s3017_s1 + $0xf0] sm:$0xff]  }
  0x26   : >> { %2204 = vmatpush3.bf16.msra.mxu1 %v2401_v19  ;;  %2183 = vmatprep.subr.bf16.mxu0 %v2402_v20  ;;  %v2441_v13 = vld [vmem:[%s3017_s1 + $0xa8] sm:$0xff]   ;;  %v2444_v16 = vld [vmem:[%s3017_s1 + $0x30] sm:$0xff]   ;;  %v2446_v18 = vld [vmem:[%s3017_s1 + $0x78] sm:$0xff]  }
  0x27   : >> { %2205 = vmatprep.subr.bf16.mxu1 %v2403_v21  ;;  %v2445_v17 = vld [vmem:[%s3017_s1 + $0xb0] sm:$0xff]   ;;  %v2447_v19 = vld [vmem:[%s3017_s1 + $0xf8] sm:$0xff]   ;;  %v2458_v32 = vld [vmem:[%s3017_s1 + $0x248] sm:$0xff]  }
  0x28   : >> { %v2448_v20 = vld [vmem:[%s3017_s1 + $0x38] sm:$0xff]   ;;  %v2459_v33 = vld [vmem:[%s3017_s1 + $0x2c8] sm:$0xff]   ;;  %v2462_v36 = vld [vmem:[%s3017_s1 + $0x250] sm:$0xff]  }
  0x29   : >> { %2184 = vmatpush3.bf16.msra.mxu0 %v2404_v22  ;;  %v2449_v21 = vld [vmem:[%s3017_s1 + $0xb8] sm:$0xff]   ;;  %v211_v22 = vld [vmem:[%s2698_s14] sm:$0x33]  ;;  %v2460_v34 = vld [vmem:[%s3017_s1 + $0x208] sm:$0xff]  }
  0x2a   : >> { %2206 = vmatpush3.bf16.msra.mxu1 %v2405_v23  ;;  %2185 = vmatprep.subr.bf16.mxu0 %v2406_v24  ;;  %v212_v23 = vld [vmem:[%s2698_s14 + $0x8] sm:$0x33]  ;;  %v1928_v24 = vcombine.high %v211_v22, %v211_v22  ;;  %v2463_v37 = vld [vmem:[%s3017_s1 + $0x2d0] sm:$0xff]   ;;  %v2466_v40 = vld [vmem:[%s3017_s1 + $0x258] sm:$0xff]  }
  0x2b   : >> { %2207 = vmatprep.subr.bf16.mxu1 %v2407_v25  ;;  %v2454_v25 = vld [vmem:[%s3017_s1 + $0x240] sm:$0xff]   ;;  %v2461_v35 = vld [vmem:[%s3017_s1 + $0x288] sm:$0xff]   ;;  %v2467_v41 = vld [vmem:[%s3017_s1 + $0x2d8] sm:$0xff]  }
  0x2c   : >> { %v2468_v42 = vld [vmem:[%s3017_s1 + $0x218] sm:$0xff]   ;;  %v2470_v44 = vld [vmem:[%s3017_s1 + $0x260] sm:$0xff]   ;;  %v2474_v48 = vld [vmem:[%s3017_s1 + $0x268] sm:$0xff]  }
  0x2d   : >> { %2186 = vmatpush3.bf16.msra.mxu0 %v2408_v26  ;;  %v1930_v26 = vcombine.high %v212_v23, %v212_v23  ;;  %v2469_v43 = vld [vmem:[%s3017_s1 + $0x298] sm:$0xff]   ;;  %v2471_v45 = vld [vmem:[%s3017_s1 + $0x2e0] sm:$0xff]   ;;  %v2475_v49 = vld [vmem:[%s3017_s1 + $0x2e8] sm:$0xff]  }
  0x2e   : >> { %2208 = vmatpush3.bf16.msra.mxu1 %v2409_v27  ;;  %2187 = vmatprep.subr.bf16.mxu0 %v2410_v28  ;;  %v2455_v27 = vld [vmem:[%s3017_s1 + $0x2c0] sm:$0xff]   ;;  %v2478_v52 = vld [vmem:[%s3017_s1 + $0x270] sm:$0xff]  }
  0x2f   : >> { %2209 = vmatprep.subr.bf16.mxu1 %v2411_v29  ;;  %v2456_v28 = vld [vmem:[%s3017_s1 + $0x200] sm:$0xff]   ;;  %v1927_v29 = vcombine.low %v211_v22, %v211_v22  ;;  %v2479_v53 = vld [vmem:[%s3017_s1 + $0x2f0] sm:$0xff]   ;;  %v2510_v22 = vld [vmem:[%s3017_s1 + $0x368] sm:$0xff]  }
  0x30   : >> { %v2472_v46 = vld [vmem:[%s3017_s1 + $0x220] sm:$0xff]   ;;  %v2480_v54 = vld [vmem:[%s3017_s1 + $0x230] sm:$0xff]  }
  0x31   : >> { %2188 = vmatpush3.bf16.msra.mxu0 %v2412_v30  ;;  %v1929_v30 = vcombine.low %v212_v23, %v212_v23  ;;  %v2473_v47 = vld [vmem:[%s3017_s1 + $0x2a0] sm:$0xff]   ;;  %v2481_v55 = vld [vmem:[%s3017_s1 + $0x2b0] sm:$0xff]   ;;  %v2511_v23 = vld [vmem:[%s3017_s1 + $0x3e8] sm:$0xff]  }
  0x32   : >> { %2210 = vmatpush3.bf16.msra.mxu1 %v2413_v31  ;;  %2217 = vmatprep.subr.bf16.mxu0 %v2418_v38  ;;  %v2457_v31 = vld [vmem:[%s3017_s1 + $0x280] sm:$0xff]   ;;  %v2464_v38 = vld [vmem:[%s3017_s1 + $0x210] sm:$0xff]  }
  0x33   : >> { %2239 = vmatprep.subr.bf16.mxu1 %v2419_v39  ;;  %v2465_v39 = vld [vmem:[%s3017_s1 + $0x290] sm:$0xff]  }
  0x34   : >> { %611 = vmatmul.mubr.bf16.vlgmr.msra.gmra.mrb[0].mxu0 %v360_v57  ;;  %v2483_v57 = vld [vmem:[%s3017_s1 + $0x2f8] sm:$0xff]  }
  0x35   : >> { %651 = vmatmul.mubr.bf16.vlgmr.msra.gmra.mrb[0].mxu1 %v374_v58  ;;  %2218 = vmatpush3.bf16.msra.mxu0 %v2420_v50  ;;  %v2476_v50 = vld [vmem:[%s3017_s1 + $0x228] sm:$0xff]   ;;  %v2484_v58 = vld [vmem:[%s3017_s1 + $0x238] sm:$0xff]  }
  0x36   : >> { %2240 = vmatpush3.bf16.msra.mxu1 %v2421_v51  ;;  %2219 = vmatprep.subr.bf16.mxu0 %v2422_v56  ;;  %v2477_v51 = vld [vmem:[%s3017_s1 + $0x2a8] sm:$0xff]   ;;  %v2482_v56 = vld [vmem:[%s3017_s1 + $0x278] sm:$0xff]  }
  0x37   : >> { %2241 = vmatprep.subr.bf16.mxu1 %v2423_v59  ;;  %896 = vmatprep.mubr.bf16.mxu0 %v1928_v24  ;;  %v2485_v59 = vld [vmem:[%s3017_s1 + $0x2b8] sm:$0xff]   ;;  %v2512_v24 = vld [vmem:[%s3017_s1 + $0x328] sm:$0xff]  }
  0x38   : >> { %936 = vmatprep.mubr.bf16.mxu1 %v1930_v26  ;;  %v2514_v26 = vld [vmem:[%s3017_s1 + $0x370] sm:$0xff]  }
  0x39   : >> { %2220 = vmatpush3.bf16.msra.mxu0 %v2424_v60  ;;  %v1964_v60 = vld [vmem:[%s2698_s14 + $0x10] sm:$0x33] }
  0x3a   : >> { %2242 = vmatpush3.bf16.msra.mxu1 %v2425_v61  ;;  %2221 = vmatprep.subr.bf16.mxu0 %v2426_v62  ;;  %v1965_v61 = vld [vmem:[%s2698_s14 + $0x18] sm:$0x33]  ;;  %v2031_v62 = vcombine.high %v1964_v60, %v1964_v60 }
  0x3b   : >> { %2243 = vmatprep.subr.bf16.mxu1 %v2427_v63  ;;  %v2490_v63 = vld [vmem:[%s3017_s1 + $0x340] sm:$0xff]  }
  0x3d   : >> { %2222 = vmatpush3.bf16.msra.mxu0 %v2428_v0  ;;  %v2033_v0 = vcombine.high %v1965_v61, %v1965_v61 }
  0x3e   : >> { %2244 = vmatpush3.bf16.msra.mxu1 %v2429_v1  ;;  %2223 = vmatprep.subr.bf16.mxu0 %v2430_v2  ;;  %v2491_v1 = vld [vmem:[%s3017_s1 + $0x3c0] sm:$0xff]   ;;  %v2030_v2 = vcombine.low %v1964_v60, %v1964_v60 }
  0x3f   : >> { %2245 = vmatprep.subr.bf16.mxu1 %v2431_v3  ;;  %v2032_v3 = vcombine.low %v1965_v61, %v1965_v61 }
  0x41   : >> { %2224 = vmatpush3.bf16.msra.mxu0 %v2432_v4  ;;  %v2492_v4 = vld [vmem:[%s3017_s1 + $0x300] sm:$0xff]  }
  0x42   : >> { %2246 = vmatpush3.bf16.msra.mxu1 %v2433_v5  ;;  %2225 = vmatprep.subr.bf16.mxu0 %v2434_v6  ;;  %v2493_v5 = vld [vmem:[%s3017_s1 + $0x380] sm:$0xff]   ;;  %v2494_v6 = vld [vmem:[%s3017_s1 + $0x348] sm:$0xff]  }
  0x43   : >> { %2247 = vmatprep.subr.bf16.mxu1 %v2435_v7  ;;  %v2495_v7 = vld [vmem:[%s3017_s1 + $0x3c8] sm:$0xff]  }
  0x45   : >> { %2226 = vmatpush3.bf16.msra.mxu0 %v2436_v8  ;;  %v2496_v8 = vld [vmem:[%s3017_s1 + $0x308] sm:$0xff]  }
  0x46   : >> { %2248 = vmatpush3.bf16.msra.mxu1 %v2437_v9  ;;  %2227 = vmatprep.subr.bf16.mxu0 %v2438_v10  ;;  %v2497_v9 = vld [vmem:[%s3017_s1 + $0x388] sm:$0xff]   ;;  %v2498_v10 = vld [vmem:[%s3017_s1 + $0x350] sm:$0xff]  }
  0x47   : >> { %2249 = vmatprep.subr.bf16.mxu1 %v2439_v11  ;;  %v2499_v11 = vld [vmem:[%s3017_s1 + $0x3d0] sm:$0xff]  }
  0x49   : >> { %2228 = vmatpush3.bf16.msra.mxu0 %v2440_v12  ;;  %v2500_v12 = vld [vmem:[%s3017_s1 + $0x310] sm:$0xff]  }
  0x4a   : >> { %2250 = vmatpush3.bf16.msra.mxu1 %v2441_v13  ;;  %2229 = vmatprep.subr.bf16.mxu0 %v2442_v14  ;;  %v2501_v13 = vld [vmem:[%s3017_s1 + $0x390] sm:$0xff]   ;;  %v2502_v14 = vld [vmem:[%s3017_s1 + $0x358] sm:$0xff]  }
  0x4b   : >> { %2251 = vmatprep.subr.bf16.mxu1 %v2443_v15  ;;  %v2503_v15 = vld [vmem:[%s3017_s1 + $0x3d8] sm:$0xff]  }
  0x4d   : >> { %2230 = vmatpush3.bf16.msra.mxu0 %v2444_v16  ;;  %v2504_v16 = vld [vmem:[%s3017_s1 + $0x318] sm:$0xff]  }
  0x4e   : >> { %2252 = vmatpush3.bf16.msra.mxu1 %v2445_v17  ;;  %2231 = vmatprep.subr.bf16.mxu0 %v2446_v18  ;;  %v2505_v17 = vld [vmem:[%s3017_s1 + $0x398] sm:$0xff]   ;;  %v2506_v18 = vld [vmem:[%s3017_s1 + $0x360] sm:$0xff]  }
  0x4f   : >> { %2253 = vmatprep.subr.bf16.mxu1 %v2447_v19  ;;  %v2507_v19 = vld [vmem:[%s3017_s1 + $0x3e0] sm:$0xff]  }
  0x51   : >> { %2232 = vmatpush3.bf16.msra.mxu0 %v2448_v20  ;;  %v2508_v20 = vld [vmem:[%s3017_s1 + $0x320] sm:$0xff]  }
  0x52   : >> { %2254 = vmatpush3.bf16.msra.mxu1 %v2449_v21  ;;  %2261 = vmatprep.subr.bf16.mxu0 %v2454_v25  ;;  %v2509_v21 = vld [vmem:[%s3017_s1 + $0x3a0] sm:$0xff]   ;;  %v2513_v25 = vld [vmem:[%s3017_s1 + $0x3a8] sm:$0xff]  }
  0x53   : >> { %2283 = vmatprep.subr.bf16.mxu1 %v2455_v27  ;;  %v2515_v27 = vld [vmem:[%s3017_s1 + $0x3f0] sm:$0xff]  }
  0x54   : >> { %897 = vmatmul.mubr.bf16.vlgmr.msra.gmra.mrb[4].mxu0 %v1927_v29  ;;  %v2517_v29 = vld [vmem:[%s3017_s1 + $0x3b0] sm:$0xff]  }
  0x55   : >> { %937 = vmatmul.mubr.bf16.vlgmr.msra.gmra.mrb[4].mxu1 %v1929_v30  ;;  %2262 = vmatpush3.bf16.msra.mxu0 %v2456_v28  ;;  %v2516_v28 = vld [vmem:[%s3017_s1 + $0x330] sm:$0xff]   ;;  %v2518_v30 = vld [vmem:[%s3017_s1 + $0x378] sm:$0xff]  }
  0x56   : >> { %2284 = vmatpush3.bf16.msra.mxu1 %v2457_v31  ;;  %2263 = vmatprep.subr.bf16.mxu0 %v2458_v32  ;;  %v2519_v31 = vld [vmem:[%s3017_s1 + $0x3f8] sm:$0xff]  }
  0x57   : >> { %2285 = vmatprep.subr.bf16.mxu1 %v2459_v33  ;;  %1253 = vmatprep.mubr.bf16.mxu0 %v2031_v62  ;;  %v2520_v32 = vld [vmem:[%s3017_s1 + $0x338] sm:$0xff]  }
  0x58   : >> { %1293 = vmatprep.mubr.bf16.mxu1 %v2033_v0  ;;  %v2521_v33 = vld [vmem:[%s3017_s1 + $0x3b8] sm:$0xff]  }
  0x59   : >> { %2264 = vmatpush3.bf16.msra.mxu0 %v2460_v34  ;;  %v2066_v34 = vld [vmem:[%s2698_s14 + $0x10] sm:$0x77] }
  0x5a   : >> { %2286 = vmatpush3.bf16.msra.mxu1 %v2461_v35  ;;  %2265 = vmatprep.subr.bf16.mxu0 %v2462_v36  ;;  %v2132_v35 = vcombine.low %v2066_v34, %v2066_v34  ;;  %v2133_v36 = vcombine.high %v2066_v34, %v2066_v34 }
  0x5b   : >> { %2287 = vmatprep.subr.bf16.mxu1 %v2463_v37  ;;  %v2067_v37 = vld [vmem:[%s2698_s14 + $0x18] sm:$0x77]  ;;  %s2168_s14 = sshll.u32 %s2556_s21, 1  ;;  %s206_s21 = sadd.s32 1, %s2556_s21  }
  0x5c   : >> { %s1689_s25 = scalar_lea.vmem %s2594_s17, %s2168_s14  ;;  %p203_p5 = scmp.ge.s32.totalorder %s206_s21, 4  }
  0x5d   : >> { %2266 = vmatpush3.bf16.msra.mxu0 %v2464_v38  ;;  %v2134_v38 = vcombine.low %v2067_v37, %v2067_v37 }
  0x5e   : >> { %2288 = vmatpush3.bf16.msra.mxu1 %v2465_v39  ;;  %2267 = vmatprep.subr.bf16.mxu0 %v2466_v40  ;;  %v2135_v39 = vcombine.high %v2067_v37, %v2067_v37  ;;  %v1387_v40 = vshrl.u32 %v2133_v36, 16 }
  0x5f   : >> { %2289 = vmatprep.subr.bf16.mxu1 %v2467_v41  ;;  %v1389_v41 = vshll.u32 %v2133_v36, 16 }
  0x61   : >> { %2268 = vmatpush3.bf16.msra.mxu0 %v2468_v42  ;;  %v1380_v42 = vshrl.u32 %v2132_v35, 16 }
  0x62   : >> { %2290 = vmatpush3.bf16.msra.mxu1 %v2469_v43  ;;  %2269 = vmatprep.subr.bf16.mxu0 %v2470_v44  ;;  %v1382_v43 = vshll.u32 %v2132_v35, 16  ;;  %v1401_v44 = vshrl.u32 %v2135_v39, 16 }
  0x63   : >> { %2291 = vmatprep.subr.bf16.mxu1 %v2471_v45  ;;  %v1403_v45 = vshll.u32 %v2135_v39, 16 }
  0x65   : >> { %2270 = vmatpush3.bf16.msra.mxu0 %v2472_v46  ;;  %v1394_v46 = vshrl.u32 %v2134_v38, 16 }
  0x66   : >> { %2292 = vmatpush3.bf16.msra.mxu1 %v2473_v47  ;;  %2271 = vmatprep.subr.bf16.mxu0 %v2474_v48  ;;  %v1396_v47 = vshll.u32 %v2134_v38, 16  ;;  %v1391_v48 = vrot.slane %v1389_v41, 1 }
  0x67   : >> { %2293 = vmatprep.subr.bf16.mxu1 %v2475_v49  ;;  %v1384_v49 = vrot.slane %v1382_v43, 1 }
  0x69   : >> { %2272 = vmatpush3.bf16.msra.mxu0 %v2476_v50  ;;  %v1405_v50 = vrot.slane %v1403_v45, 1 }
  0x6a   : >> { %2294 = vmatpush3.bf16.msra.mxu1 %v2477_v51  ;;  %2273 = vmatprep.subr.bf16.mxu0 %v2478_v52  ;;  %v1398_v51 = vrot.slane %v1396_v47, 1  ;;  %v1392_v52 = vor.u32 %v1391_v48, %v1387_v40 }
  0x6b   : >> { %2295 = vmatprep.subr.bf16.mxu1 %v2479_v53  ;;  %v1385_v53 = vor.u32 %v1384_v49, %v1380_v42 }
  0x6d   : >> { %2274 = vmatpush3.bf16.msra.mxu0 %v2480_v54  ;;  %v1406_v54 = vor.u32 %v1405_v50, %v1401_v44 }
  0x6e   : >> { %2296 = vmatpush3.bf16.msra.mxu1 %v2481_v55  ;;  %2275 = vmatprep.subr.bf16.mxu0 %v2482_v56  ;;  %v1399_v55 = vor.u32 %v1398_v51, %v1394_v46 }
  0x6f   : >> { %2297 = vmatprep.subr.bf16.mxu1 %v2483_v57 }
  0x71   : >> { %2276 = vmatpush3.bf16.msra.mxu0 %v2484_v58 }
  0x72   : >> { %2298 = vmatpush3.bf16.msra.mxu1 %v2485_v59  ;;  %2305 = vmatprep.subr.bf16.mxu0 %v2490_v63 }
  0x73   : >> { %2327 = vmatprep.subr.bf16.mxu1 %v2491_v1 }
  0x74   : >> { %1254 = vmatmul.mubr.bf16.vlgmr.msra.gmra.mrb[8].mxu0 %v2030_v2 }
  0x75   : >> { %1294 = vmatmul.mubr.bf16.vlgmr.msra.gmra.mrb[8].mxu1 %v2032_v3  ;;  %2306 = vmatpush3.bf16.msra.mxu0 %v2492_v4 }
  0x76   : >> { %2328 = vmatpush3.bf16.msra.mxu1 %v2493_v5  ;;  %2307 = vmatprep.subr.bf16.mxu0 %v2494_v6 }
  0x77   : >> { %2329 = vmatprep.subr.bf16.mxu1 %v2495_v7  ;;  %1635 = vmatprep.mubr.bf16.mxu0 %v1392_v52 }
  0x78   : >> { %1675 = vmatprep.mubr.bf16.mxu1 %v1406_v54 }
  0x79   : >> { %2308 = vmatpush3.bf16.msra.mxu0 %v2496_v8 }
  0x7a   : >> { %2330 = vmatpush3.bf16.msra.mxu1 %v2497_v9  ;;  %2309 = vmatprep.subr.bf16.mxu0 %v2498_v10 }
  0x7b   : >> { %2331 = vmatprep.subr.bf16.mxu1 %v2499_v11 }
  0x7d   : >> { %2310 = vmatpush3.bf16.msra.mxu0 %v2500_v12 }
  0x7e   : >> { %2332 = vmatpush3.bf16.msra.mxu1 %v2501_v13  ;;  %2311 = vmatprep.subr.bf16.mxu0 %v2502_v14 }
  0x7f   : >> { %2333 = vmatprep.subr.bf16.mxu1 %v2503_v15 }
  0x81   : >> { %2312 = vmatpush3.bf16.msra.mxu0 %v2504_v16 }
  0x82   : >> { %2334 = vmatpush3.bf16.msra.mxu1 %v2505_v17  ;;  %2313 = vmatprep.subr.bf16.mxu0 %v2506_v18 }
  0x83   : >> { %2335 = vmatprep.subr.bf16.mxu1 %v2507_v19 }
  0x85   : >> { %2314 = vmatpush3.bf16.msra.mxu0 %v2508_v20 }
  0x86   : >> { %2336 = vmatpush3.bf16.msra.mxu1 %v2509_v21  ;;  %2315 = vmatprep.subr.bf16.mxu0 %v2510_v22 }
  0x87   : >> { %2337 = vmatprep.subr.bf16.mxu1 %v2511_v23 }
  0x89   : >> { %2316 = vmatpush3.bf16.msra.mxu0 %v2512_v24 }
  0x8a   : >> { %2338 = vmatpush3.bf16.msra.mxu1 %v2513_v25  ;;  %2317 = vmatprep.subr.bf16.mxu0 %v2514_v26 }
  0x8b   : >> { %2339 = vmatprep.subr.bf16.mxu1 %v2515_v27 }
  0x8d   : >> { %2318 = vmatpush3.bf16.msra.mxu0 %v2516_v28 }
  0x8e   : >> { %2340 = vmatpush3.bf16.msra.mxu1 %v2517_v29  ;;  %2319 = vmatprep.subr.bf16.mxu0 %v2518_v30 }
  0x8f   : >> { %2341 = vmatprep.subr.bf16.mxu1 %v2519_v31 }
  0x91   : >> { %2320 = vmatpush3.bf16.msra.mxu0 %v2520_v32 }
  0x92   : >> { %2342 = vmatpush3.bf16.msra.mxu1 %v2521_v33 }
  0x94   : >> { %1636 = vmatmul.mubr.bf16.vlgmr.msra.gmra.mrb[12].mxu0 %v1385_v53 }
  0x95   : >> { %1676 = vmatmul.mubr.bf16.vlgmr.msra.gmra.mrb[12].mxu1 %v1399_v55 }
 0x107   : >> { %v2189_v56 = vpop.f32.mrb[0].mxu0 }
 0x108   : >> { %v2211_v57 = vpop.f32.mrb[0].mxu1  ;;  %v2190_v58 = vpop.f32.mrb[1].mxu0 }
 0x109   : >> { %v2212_v59 = vpop.f32.mrb[1].mxu1  ;;  %v2191_v60 = vadd.f32 %v2190_v58, %v2189_v56  ;;  %v2192_v62 = vpop.f32.mrb[2].mxu0 }
 0x10a   : >> { %v2213_v61 = vadd.f32 %v2212_v59, %v2211_v57  ;;  %v2214_v63 = vpop.f32.mrb[2].mxu1  ;;  %v2193_v0 = vpop.f32.mrb[3].mxu0 }
 0x10b   : >> { %v2215_v1 = vpop.f32.mrb[3].mxu1 }
 0x10c   : >> { %v653_v2 = vadd.f32 %v2213_v61, %v2191_v60 }
 0x127   : >> { %v2233_v3 = vpop.f32.mrb[4].mxu0 }
 0x128   : >> { %v2255_v4 = vpop.f32.mrb[4].mxu1  ;;  %v2234_v5 = vpop.f32.mrb[5].mxu0 }
 0x129   : >> { %v2256_v6 = vpop.f32.mrb[5].mxu1  ;;  %v2235_v7 = vadd.f32 %v2234_v5, %v2233_v3  ;;  %v2236_v9 = vpop.f32.mrb[6].mxu0 }
 0x12a   : >> { %v2257_v8 = vadd.f32 %v2256_v6, %v2255_v4  ;;  %v2258_v10 = vpop.f32.mrb[6].mxu1  ;;  %v2237_v11 = vpop.f32.mrb[7].mxu0 }
 0x12b   : >> { %v2259_v12 = vpop.f32.mrb[7].mxu1  ;;  %v899_v13 = vadd.f32 %v2235_v7, %v653_v2 }
 0x12d   : >> { %v939_v14 = vadd.f32 %v2257_v8, %v899_v13 }
 0x147   : >> { %v2277_v15 = vpop.f32.mrb[8].mxu0 }
 0x148   : >> { %v2299_v16 = vpop.f32.mrb[8].mxu1  ;;  %v2278_v17 = vpop.f32.mrb[9].mxu0 }
 0x149   : >> { %v2300_v18 = vpop.f32.mrb[9].mxu1  ;;  %v2279_v19 = vadd.f32 %v2278_v17, %v2277_v15  ;;  %v2280_v21 = vpop.f32.mrb[10].mxu0 }
 0x14a   : >> { %v2301_v20 = vadd.f32 %v2300_v18, %v2299_v16  ;;  %v2302_v22 = vpop.f32.mrb[10].mxu1  ;;  %v2281_v23 = vpop.f32.mrb[11].mxu0 }
 0x14b   : >> { %v2303_v24 = vpop.f32.mrb[11].mxu1 }
 0x14c   : >> { %v1296_v25 = vadd.f32 %v2301_v20, %v2279_v19 }
 0x14e   : >> { %v1301_v26 = vadd.f32 %v1296_v25, %v939_v14 }
 0x167   : >> { %v2321_v27 = vpop.f32.mrb[12].mxu0 }
 0x168   : >> { %v2343_v28 = vpop.f32.mrb[12].mxu1  ;;  %v2322_v29 = vpop.f32.mrb[13].mxu0 }
 0x169   : >> { %v2323_v30 = vadd.f32 %v2322_v29, %v2321_v27  ;;  %v2344_v31 = vpop.f32.mrb[13].mxu1  ;;  %v2324_v32 = vpop.f32.mrb[14].mxu0 }
 0x16a   : >> { %v2345_v33 = vadd.f32 %v2344_v31, %v2343_v28  ;;  %v2346_v34 = vpop.f32.mrb[14].mxu1  ;;  %v2325_v35 = vpop.f32.mrb[15].mxu0 }
 0x16b   : >> { %v2347_v36 = vpop.f32.mrb[15].mxu1 }
 0x16c   : >> { %v1678_v37 = vadd.f32 %v2345_v33, %v2323_v30 }
 0x16e   : >> { %v1683_v38 = vadd.f32 %v1678_v37, %v1301_v26 }
 0x16f   : > { %205 = sbr.rel (!%p203_p5) target bundleno = 18 (0x12), region = 74 }
 0x170   : >> { %vm1684_vm0 = vcmp.ge.f32.partialorder %v1683_v38, 0.0  ;;  %v1685_v39 = vmul.f32 0.2, %v1683_v38 }
 0x172   : >> { %v1686_v40 = vsel %vm1684_vm0, %v1683_v38, %v1685_v39 }
 0x173   : >> { %v1687_v41 = vpack.c.bf16 %v1686_v40, %v1686_v40 }
 0x175   : >> { %1690 = vst [vmem:[%s1689_s25] sm:$0x3] %v1687_v41 }
 0x176 PF: > { %s12_s11 = sadd.s32 1, %s2552_s11   ;;  %s3019_s9 = smov %s2548_s10 }
 0x177   : > { %p9_p6 = scmp.ge.s32.totalorder %s12_s11, 4   ;;  %s3020_s10 = smov %s3022_s12 }
 0x179   :  { %11 = sbr.rel (!%p9_p6) target bundleno = 2 (0x2), region = 85 }

</bundles_post_ra>
